<compile_context>
chip_gen: v5e
topology: v5e:2x2
jax: 0.10.0
libtpu: 0.0.40
codegen_flags: <defaults>
</compile_context>

<pallas_src>
import functools

import jax
import jax.numpy as jnp
from jax import lax
from jax.experimental import pallas as pl
from jax.experimental.pallas import tpu as pltpu


# ----------------------------------------------------------------------------
# Pallas kernel: 3x3 conv (pad=1, stride=1) for one batch element
# ----------------------------------------------------------------------------
def _conv3x3_kernel(x_ref, w_ref, b_ref, o_ref, patch_ref, *, H, W, Cin):
    """x_ref:    (1, H+2, W+2, Cin)  padded NHWC input (VMEM)
       w_ref:    (9*Cin, Cout)       im2col weight, tap-major / channel-minor
       b_ref:    (1, Cout)
       o_ref:    (1, H*W, Cout)
       patch_ref:(H, W, 9*Cin)       VMEM scratch for the im2col patch tensor
    """
    # Build the im2col tensor with 9 static shifted-slice stores.
    # No per-tap reshape, no lane-dim concatenate -- just masked sub-lane vst.
    for kh in range(3):
        for kw in range(3):
            t = kh * 3 + kw
            patch_ref[:, :, t * Cin:(t + 1) * Cin] = \
                x_ref[0, kh:kh + H, kw:kw + W, :]

    # One relayout, then ONE MXU matmul with K = 9*Cin (instead of 9 tiny dots).
    patches = patch_ref[...].reshape(H * W, 9 * Cin)            # (M, K)
    acc = jnp.dot(patches, w_ref[...],
                  preferred_element_type=jnp.float32)           # (M, Cout)
    acc = acc + b_ref[...]                                      # fused bias
    o_ref[0] = acc


def projection_conv3x3(x_nchw, w, b):
    """PyTorch Projection.forward: nn.Conv2d(in_chs, out_chs, 3, padding=1).

    x_nchw: (B, Cin, H, W)  (PyTorch NCHW)
    w:      (Cout, Cin, 3, 3)  (PyTorch OIHW)
    b:      (Cout,)
    returns (B, Cout, H, W)
    """
    B, Cin, H, W = x_nchw.shape
    Cout = w.shape[0]

    # channels-last so channels live on the 128-wide lane axis
    x = jnp.transpose(x_nchw, (0, 2, 3, 1))                     # (B, H, W, Cin)
    xp = jnp.pad(x, ((0, 0), (1, 1), (1, 1), (0, 0)))           # single pad
    Hp, Wp = H + 2, W + 2

    # (Cout,Cin,3,3) -> (3,3,Cin,Cout) -> (9*Cin, Cout): matches the in-kernel
    # tap-major / channel-minor im2col ordering.
    wk = jnp.transpose(w, (2, 3, 1, 0)).reshape(9 * Cin, Cout)
    bb = b.reshape(1, Cout)

    kern = functools.partial(_conv3x3_kernel, H=H, W=W, Cin=Cin)
    out = pl.pallas_call(
        kern,
        out_shape=jax.ShapeDtypeStruct((B, H * W, Cout), jnp.float32),
        grid=(B,),
        in_specs=[
            pl.BlockSpec((1, Hp, Wp, Cin), lambda i: (i, 0, 0, 0)),
            pl.BlockSpec((9 * Cin, Cout), lambda i: (0, 0)),
            pl.BlockSpec((1, Cout), lambda i: (0, 0)),
        ],
        out_specs=pl.BlockSpec((1, H * W, Cout), lambda i: (i, 0, 0)),
        scratch_shapes=[pltpu.VMEM((H, W, 9 * Cin), jnp.float32)],
        compiler_params=pltpu.CompilerParams(
            dimension_semantics=("parallel",),      # lets v7x's 2 TCs split B
            vmem_limit_bytes=64 << 20,
        ),
    )(xp, wk, bb)

    out = out.reshape(B, H, W, Cout)                            # free bitcast
    return jnp.transpose(out, (0, 3, 1, 2))                     # back to NCHW


# ----------------------------------------------------------------------------
if __name__ == "__main__":
    B, Cin, H, W = 2, 4, 16, 16
    Cout = 32

    key = jax.random.PRNGKey(0)
    kx, kw, kb = jax.random.split(key, 3)
    x = jax.random.normal(kx, (B, Cin, H, W), jnp.float32)
    w = jax.random.normal(kw, (Cout, Cin, 3, 3), jnp.float32) / jnp.sqrt(9 * Cin)
    b = 0.01 * jax.random.normal(kb, (Cout,), jnp.float32)

    out = projection_conv3x3(x, w, b)
    jax.block_until_ready(out)
    assert out.shape == (B, Cout, H, W)

    # fp32 reference (XLA conv, highest precision) for a correctness gate.
    ref = lax.conv_general_dilated(
        x, w, window_strides=(1, 1), padding=((1, 1), (1, 1)),
        dimension_numbers=("NCHW", "OIHW", "NCHW"),
        precision=lax.Precision.HIGHEST) + b.reshape(1, Cout, 1, 1)
    err = float(jnp.max(jnp.abs(out - ref)))
    assert jnp.allclose(out, ref, atol=1e-4, rtol=1e-4), err

    print("KERNEL_OK")
</pallas_src>

<mosaic_0001>
module attributes {stable_mosaic.version = 11 : i64} {
  func.func @_conv3x3_kernel(%arg0: i32, %arg1: memref<1x18x18x4xf32, #tpu.memory_space<vmem>>, %arg2: memref<36x32xf32, #tpu.memory_space<vmem>>, %arg3: memref<1x32xf32, #tpu.memory_space<vmem>>, %arg4: memref<1x256x32xf32, #tpu.memory_space<vmem>>, %arg5: memref<16x16x36xf32, #tpu.memory_space<vmem>>) attributes {dimension_semantics = [#tpu.dimension_semantics<parallel>], iteration_bounds = array<i64: 2>, scalar_prefetch = 0 : i64, scratch_operands = 1 : i64, tpu.core_type = #tpu.core_type<tc>, window_params = [{transform_indices = @transform_0, window_bounds = array<i64: 1, 18, 18, 4>}, {pipeline_mode = #tpu.pipeline_mode<synchronous>, transform_indices = @transform_1, window_bounds = array<i64: 36, 32>}, {pipeline_mode = #tpu.pipeline_mode<synchronous>, transform_indices = @transform_2, window_bounds = array<i64: 1, 32>}, {transform_indices = @transform_3, window_bounds = array<i64: 1, 256, 32>}]} {
    %c0 = arith.constant 0 : index
    %c0_0 = arith.constant 0 : index
    %c0_1 = arith.constant 0 : index
    %c0_2 = arith.constant 0 : index
    %0 = vector.load %arg1[%c0, %c0_0, %c0_1, %c0_2] : memref<1x18x18x4xf32, #tpu.memory_space<vmem>>, vector<1x16x16x4xf32>
    %1 = vector.shape_cast %0 : vector<1x16x16x4xf32> to vector<16x16x4xf32>
    %c0_3 = arith.constant 0 : index
    %c0_4 = arith.constant 0 : index
    %c0_5 = arith.constant 0 : index
    %2 = vector.load %arg5[%c0_3, %c0_4, %c0_5] : memref<16x16x36xf32, #tpu.memory_space<vmem>>, vector<16x16x4xf32>
    tpu.vector_store %arg5[%c0_3, %c0_4, %c0_5], %1 {strides = array<i32>} : memref<16x16x36xf32, #tpu.memory_space<vmem>>, vector<16x16x4xf32>,
    %c0_6 = arith.constant 0 : index
    %c0_7 = arith.constant 0 : index
    %c1 = arith.constant 1 : index
    %c0_8 = arith.constant 0 : index
    %3 = vector.load %arg1[%c0_6, %c0_7, %c1, %c0_8] : memref<1x18x18x4xf32, #tpu.memory_space<vmem>>, vector<1x16x16x4xf32>
    %4 = vector.shape_cast %3 : vector<1x16x16x4xf32> to vector<16x16x4xf32>
    %c0_9 = arith.constant 0 : index
    %c0_10 = arith.constant 0 : index
    %c4 = arith.constant 4 : index
    %5 = vector.load %arg5[%c0_9, %c0_10, %c4] : memref<16x16x36xf32, #tpu.memory_space<vmem>>, vector<16x16x4xf32>
    tpu.vector_store %arg5[%c0_9, %c0_10, %c4], %4 {strides = array<i32>} : memref<16x16x36xf32, #tpu.memory_space<vmem>>, vector<16x16x4xf32>,
    %c0_11 = arith.constant 0 : index
    %c0_12 = arith.constant 0 : index
    %c2 = arith.constant 2 : index
    %c0_13 = arith.constant 0 : index
    %6 = vector.load %arg1[%c0_11, %c0_12, %c2, %c0_13] : memref<1x18x18x4xf32, #tpu.memory_space<vmem>>, vector<1x16x16x4xf32>
    %7 = vector.shape_cast %6 : vector<1x16x16x4xf32> to vector<16x16x4xf32>
    %c0_14 = arith.constant 0 : index
    %c0_15 = arith.constant 0 : index
    %c8 = arith.constant 8 : index
    %8 = vector.load %arg5[%c0_14, %c0_15, %c8] : memref<16x16x36xf32, #tpu.memory_space<vmem>>, vector<16x16x4xf32>
    tpu.vector_store %arg5[%c0_14, %c0_15, %c8], %7 {strides = array<i32>} : memref<16x16x36xf32, #tpu.memory_space<vmem>>, vector<16x16x4xf32>,
    %c0_16 = arith.constant 0 : index
    %c1_17 = arith.constant 1 : index
    %c0_18 = arith.constant 0 : index
    %c0_19 = arith.constant 0 : index
    %9 = vector.load %arg1[%c0_16, %c1_17, %c0_18, %c0_19] : memref<1x18x18x4xf32, #tpu.memory_space<vmem>>, vector<1x16x16x4xf32>
    %10 = vector.shape_cast %9 : vector<1x16x16x4xf32> to vector<16x16x4xf32>
    %c0_20 = arith.constant 0 : index
    %c0_21 = arith.constant 0 : index
    %c12 = arith.constant 12 : index
    %11 = vector.load %arg5[%c0_20, %c0_21, %c12] : memref<16x16x36xf32, #tpu.memory_space<vmem>>, vector<16x16x4xf32>
    tpu.vector_store %arg5[%c0_20, %c0_21, %c12], %10 {strides = array<i32>} : memref<16x16x36xf32, #tpu.memory_space<vmem>>, vector<16x16x4xf32>,
    %c0_22 = arith.constant 0 : index
    %c1_23 = arith.constant 1 : index
    %c1_24 = arith.constant 1 : index
    %c0_25 = arith.constant 0 : index
    %12 = vector.load %arg1[%c0_22, %c1_23, %c1_24, %c0_25] : memref<1x18x18x4xf32, #tpu.memory_space<vmem>>, vector<1x16x16x4xf32>
    %13 = vector.shape_cast %12 : vector<1x16x16x4xf32> to vector<16x16x4xf32>
    %c0_26 = arith.constant 0 : index
    %c0_27 = arith.constant 0 : index
    %c16 = arith.constant 16 : index
    %14 = vector.load %arg5[%c0_26, %c0_27, %c16] : memref<16x16x36xf32, #tpu.memory_space<vmem>>, vector<16x16x4xf32>
    tpu.vector_store %arg5[%c0_26, %c0_27, %c16], %13 {strides = array<i32>} : memref<16x16x36xf32, #tpu.memory_space<vmem>>, vector<16x16x4xf32>,
    %c0_28 = arith.constant 0 : index
    %c1_29 = arith.constant 1 : index
    %c2_30 = arith.constant 2 : index
    %c0_31 = arith.constant 0 : index
    %15 = vector.load %arg1[%c0_28, %c1_29, %c2_30, %c0_31] : memref<1x18x18x4xf32, #tpu.memory_space<vmem>>, vector<1x16x16x4xf32>
    %16 = vector.shape_cast %15 : vector<1x16x16x4xf32> to vector<16x16x4xf32>
    %c0_32 = arith.constant 0 : index
    %c0_33 = arith.constant 0 : index
    %c20 = arith.constant 20 : index
    %17 = vector.load %arg5[%c0_32, %c0_33, %c20] : memref<16x16x36xf32, #tpu.memory_space<vmem>>, vector<16x16x4xf32>
    tpu.vector_store %arg5[%c0_32, %c0_33, %c20], %16 {strides = array<i32>} : memref<16x16x36xf32, #tpu.memory_space<vmem>>, vector<16x16x4xf32>,
    %c0_34 = arith.constant 0 : index
    %c2_35 = arith.constant 2 : index
    %c0_36 = arith.constant 0 : index
    %c0_37 = arith.constant 0 : index
    %18 = vector.load %arg1[%c0_34, %c2_35, %c0_36, %c0_37] : memref<1x18x18x4xf32, #tpu.memory_space<vmem>>, vector<1x16x16x4xf32>
    %19 = vector.shape_cast %18 : vector<1x16x16x4xf32> to vector<16x16x4xf32>
    %c0_38 = arith.constant 0 : index
    %c0_39 = arith.constant 0 : index
    %c24 = arith.constant 24 : index
    %20 = vector.load %arg5[%c0_38, %c0_39, %c24] : memref<16x16x36xf32, #tpu.memory_space<vmem>>, vector<16x16x4xf32>
    tpu.vector_store %arg5[%c0_38, %c0_39, %c24], %19 {strides = array<i32>} : memref<16x16x36xf32, #tpu.memory_space<vmem>>, vector<16x16x4xf32>,
    %c0_40 = arith.constant 0 : index
    %c2_41 = arith.constant 2 : index
    %c1_42 = arith.constant 1 : index
    %c0_43 = arith.constant 0 : index
    %21 = vector.load %arg1[%c0_40, %c2_41, %c1_42, %c0_43] : memref<1x18x18x4xf32, #tpu.memory_space<vmem>>, vector<1x16x16x4xf32>
    %22 = vector.shape_cast %21 : vector<1x16x16x4xf32> to vector<16x16x4xf32>
    %c0_44 = arith.constant 0 : index
    %c0_45 = arith.constant 0 : index
    %c28 = arith.constant 28 : index
    %23 = vector.load %arg5[%c0_44, %c0_45, %c28] : memref<16x16x36xf32, #tpu.memory_space<vmem>>, vector<16x16x4xf32>
    tpu.vector_store %arg5[%c0_44, %c0_45, %c28], %22 {strides = array<i32>} : memref<16x16x36xf32, #tpu.memory_space<vmem>>, vector<16x16x4xf32>,
    %c0_46 = arith.constant 0 : index
    %c2_47 = arith.constant 2 : index
    %c2_48 = arith.constant 2 : index
    %c0_49 = arith.constant 0 : index
    %24 = vector.load %arg1[%c0_46, %c2_47, %c2_48, %c0_49] : memref<1x18x18x4xf32, #tpu.memory_space<vmem>>, vector<1x16x16x4xf32>
    %25 = vector.shape_cast %24 : vector<1x16x16x4xf32> to vector<16x16x4xf32>
    %c0_50 = arith.constant 0 : index
    %c0_51 = arith.constant 0 : index
    %c32 = arith.constant 32 : index
    %26 = vector.load %arg5[%c0_50, %c0_51, %c32] : memref<16x16x36xf32, #tpu.memory_space<vmem>>, vector<16x16x4xf32>
    tpu.vector_store %arg5[%c0_50, %c0_51, %c32], %25 {strides = array<i32>} : memref<16x16x36xf32, #tpu.memory_space<vmem>>, vector<16x16x4xf32>,
    %c0_52 = arith.constant 0 : index
    %c0_53 = arith.constant 0 : index
    %c0_54 = arith.constant 0 : index
    %27 = vector.load %arg5[%c0_52, %c0_53, %c0_54] : memref<16x16x36xf32, #tpu.memory_space<vmem>>, vector<16x16x36xf32>
    %28 = vector.shape_cast %27 : vector<16x16x36xf32> to vector<256x36xf32>
    %c0_55 = arith.constant 0 : index
    %c0_56 = arith.constant 0 : index
    %29 = vector.load %arg2[%c0_55, %c0_56] : memref<36x32xf32, #tpu.memory_space<vmem>>, vector<36x32xf32>
    %cst = arith.constant dense<0.000000e+00> : vector<256x32xf32>
    %30 = tpu.matmul %28, %29, %cst {dimension_numbers = #tpu.dot_dimension_numbers<[1], [0], [0], [1], [0, 0, 1, 1], [], []>} : vector<256x36xf32>, vector<36x32xf32>, vector<256x32xf32> -> vector<256x32xf32>
    %c0_57 = arith.constant 0 : index
    %c0_58 = arith.constant 0 : index
    %31 = vector.load %arg3[%c0_57, %c0_58] : memref<1x32xf32, #tpu.memory_space<vmem>>, vector<1x32xf32>
    %32 = vector.broadcast %31 : vector<1x32xf32> to vector<256x32xf32>
    %33 = arith.addf %30, %32 : vector<256x32xf32>
    %c0_59 = arith.constant 0 : index
    %c0_60 = arith.constant 0 : index
    %c0_61 = arith.constant 0 : index
    %34 = vector.load %arg4[%c0_59, %c0_60, %c0_61] : memref<1x256x32xf32, #tpu.memory_space<vmem>>, vector<1x256x32xf32>
    %35 = vector.shape_cast %34 : vector<1x256x32xf32> to vector<256x32xf32>
    %36 = vector.shape_cast %33 : vector<256x32xf32> to vector<1x256x32xf32>
    tpu.vector_store %arg4[%c0_59, %c0_60, %c0_61], %36 {strides = array<i32>} : memref<1x256x32xf32, #tpu.memory_space<vmem>>, vector<1x256x32xf32>,
    return
  }
  func.func @transform_0(%arg0: i32) -> (i32, i32, i32, i32) {
    %c0_i32 = arith.constant 0 : i32
    %c0_i32_0 = arith.constant 0 : i32
    %c0_i32_1 = arith.constant 0 : i32
    %c0_i32_2 = arith.constant 0 : i32
    return %arg0, %c0_i32, %c0_i32_0, %c0_i32_1 : i32, i32, i32, i32
  }
  func.func @transform_1(%arg0: i32) -> (i32, i32) {
    %c0_i32 = arith.constant 0 : i32
    %c0_i32_0 = arith.constant 0 : i32
    %c0_i32_1 = arith.constant 0 : i32
    return %c0_i32, %c0_i32_0 : i32, i32
  }
  func.func @transform_2(%arg0: i32) -> (i32, i32) {
    %c0_i32 = arith.constant 0 : i32
    %c0_i32_0 = arith.constant 0 : i32
    %c0_i32_1 = arith.constant 0 : i32
    return %c0_i32, %c0_i32_0 : i32, i32
  }
  func.func @transform_3(%arg0: i32) -> (i32, i32, i32) {
    %c0_i32 = arith.constant 0 : i32
    %c0_i32_0 = arith.constant 0 : i32
    %c0_i32_1 = arith.constant 0 : i32
    return %arg0, %c0_i32, %c0_i32_0 : i32, i32, i32
  }
}

</mosaic_0001>

<bundles_post_ra>
// kernel: tpu_custom_call.1
= control target key start
LH: loop header
LB: loop body
LE: loop exit
PB: predicated region body
PF: predicated region fallthrough
CT: control target
= control target key end

     0   :  { %s2430_s12 = smov 0   ;;  %s3720_s0 = inlined_call_operand.vmem [shape: f32[2,18,18,4], index: 0, kind: input, shape index: {}]   ;;  %s3721_s1 = inlined_call_operand.vmem [shape: f32[36,32], index: 1, kind: input, shape index: {}]   ;;  %s3722_s2 = inlined_call_operand.vmem [shape: f32[1,32], index: 2, kind: input, shape index: {}]   ;;  %s3723_s3 = inlined_call_operand.vmem [shape: f32[2,256,32], index: 3, kind: output, shape index: {}]  }
   0x1 LB: > { %s2125_s13 = sadd.s32 4294967295, %s2400_s12   ;;  %p2129_p0 = scmp.ge.s32.totalorder %s2400_s12, 1  ;;  %s2400_s12 = sphi %s2430_s12, %s13_s12  }
   0x2   : > { %p137_p1 = scmp.lt.s32.totalorder %s2400_s12, 3 }
   0x4   : > { %p138_p2 = pnand %p2129_p0, %p137_p1 }
   0x6   : > { %141 = sbr.rel (%p138_p2) target bundleno = 950 (0x3b6), region = 32 }
   0xb   : > { %p161_p3 = scmp.lt.s32.totalorder %s2125_s13, 1  ;;  %s2402_s18 = smov 4   ;;  %vm203_vm0 = vcmask 31744   ;;  %vm396_vm1 = vcmask 64544   ;;  %vm589_vm2 = vcmask 97344   ;;  %vm783_vm3 = vcmask 130144  }
   0xc   : > { %s2403_s19 = smov 8   ;;  %s2404_s20 = smov 12   ;;  %vm976_vm4 = vcmask 162944   ;;  %vm1169_vm5 = vcmask 195744   ;;  %vm1363_vm6 = vcmask 228544   ;;  %vm1920_vm7 = vcmask 1043456  }
   0xd   : > { %s3815_s13 = smov (!%p161_p3, %s2125_s13), 1  ;;  %s2405_s21 = smov 16   ;;  %vm1556_vm8 = vcmask 261344   ;;  %vm1749_vm9 = vcmask 294144   ;;  %vm1823_vm10 = vcmask 293888   ;;  %vm2037_vm11 = vcmask 261120  }
   0xe   : > { %s2376_s14 = smul.u32 432, %s3815_s13  ;;  %s2406_s22 = smov 20  }
   0xf   : > { %s2407_s23 = smov 24   ;;  %s2408_s24 = smov 28  }
  0x10   : > { %s2444_s17 = scalar_lea.vmem %s3720_s0, %s2376_s14  ;;  %s2409_s25 = smov 32  }
  0x11   : > { %v236_v0 = vld [vmem:[%s2444_s17 + $0x1] sm:$0xff]  ;;  %v2448_v1 = vld [vmem:[%s2444_s17 + $0x19] sm:$0xff]  ;;  %v2454_v2 = vld [vmem:[%s2444_s17 + $0x31] sm:$0xff]  ;;  %s2360_s9 = sshll.u32 %s3815_s13, 8 }
  0x12   : > { %300 = vrot.lane.b32.xlu0 %v236_v0, %s2402_s18  ;;  %304 = vrot.lane.b32.xlu1 %v2448_v1, %s2402_s18  ;;  %v237_v3 = vld [vmem:[%s2444_s17 + $0x9] sm:$0xff]  ;;  %v2460_v4 = vld [vmem:[%s2444_s17 + $0x21] sm:$0xff]  ;;  %s3587_s16 = scalar_lea.vmem %s3723_s3, %s2360_s9 }
  0x13   : > { %308 = vrot.lane.b32.xlu2 %v2454_v2, %s2402_s18  ;;  %v2466_v5 = vld [vmem:[%s2444_s17 + $0x39] sm:$0xff]  ;;  %v2471_v6 = vld [vmem:[%s2444_s17 + $0x49] sm:$0xff]  ;;  %v2474_v7 = vld [vmem:[%s2444_s17 + $0x51] sm:$0xff] }
  0x14   : > { %v2481_v8 = vld [vmem:[%s2444_s17 + $0x61] sm:$0xff]  ;;  %v2486_v9 = vld [vmem:[%s2444_s17 + $0x69] sm:$0xff]  ;;  %v2489_v10 = vld [vmem:[%s2444_s17 + $0x79] sm:$0xff] }
  0x15   : > { %v2496_v11 = vld [vmem:[%s2444_s17 + $0x81] sm:$0xff]  ;;  %v2501_v12 = vld [vmem:[%s2444_s17 + $0x91] sm:$0xff]  ;;  %v2504_v13 = vld [vmem:[%s2444_s17 + $0x99] sm:$0xff] }
  0x16   : > { %v2511_v14 = vld [vmem:[%s2444_s17 + $0xa9] sm:$0xff]  ;;  %v2516_v15 = vld [vmem:[%s2444_s17 + $0xb1] sm:$0xff]  ;;  %v2519_v16 = vld [vmem:[%s2444_s17 + $0xc1] sm:$0xff] }
  0x17   : > { %v2526_v17 = vld [vmem:[%s2444_s17 + $0xc9] sm:$0xff]  ;;  %v2531_v18 = vld [vmem:[%s2444_s17 + $0xd9] sm:$0xff]  ;;  %v2534_v19 = vld [vmem:[%s2444_s17 + $0xe1] sm:$0xff] }
  0x18   : > { %v2541_v20 = vld [vmem:[%s2444_s17 + $0xf1] sm:$0xff]  ;;  %v2546_v21 = vld [vmem:[%s2444_s17 + $0xf9] sm:$0xff]  ;;  %v2549_v22 = vld [vmem:[%s2444_s17 + $0x109] sm:$0xff] }
  0x19   : > { %v2556_v23 = vld [vmem:[%s2444_s17 + $0x111] sm:$0xff]  ;;  %v2561_v24 = vld [vmem:[%s2444_s17 + $0x121] sm:$0xff]  ;;  %v2564_v25 = vld [vmem:[%s2444_s17 + $0x129] sm:$0xff] }
  0x1a   : > { %302 = vrot.lane.b32.xlu0 %v237_v3, %s2402_s18  ;;  %306 = vrot.lane.b32.xlu1 %v2460_v4, %s2402_s18  ;;  %v2571_v26 = vld [vmem:[%s2444_s17 + $0x139] sm:$0xff]  ;;  %v2576_v27 = vld [vmem:[%s2444_s17 + $0x141] sm:$0xff] }
  0x1b   : > { %310 = vrot.lane.b32.xlu2 %v2466_v5, %s2402_s18  ;;  %v2579_v28 = vld [vmem:[%s2444_s17 + $0x151] sm:$0xff]  ;;  %v2586_v29 = vld [vmem:[%s2444_s17 + $0x159] sm:$0xff]  ;;  %v2591_v30 = vld [vmem:[%s2444_s17 + $0x169] sm:$0xff] }
  0x1c   : > { %v2594_v31 = vld [vmem:[%s2444_s17 + $0x171] sm:$0xff]  ;;  %v429_v32 = vld [vmem:[%s2444_s17 + $0x2] sm:$0xff]  ;;  %v2606_v35 = vld [vmem:[%s2444_s17 + $0x1a] sm:$0xff] }
  0x1d   : > { %v171_v33 = vld [vmem:[%s2444_s17] sm:$0xff]  ;;  %v430_v34 = vld [vmem:[%s2444_s17 + $0xa] sm:$0xff]  ;;  %3754 = vst [vmem:[#allocation3_spill] sm:$0xff] %v2606_v35  ;;  %v2615_v37 = vld [vmem:[%s2444_s17 + $0x18] sm:$0xff] }
  0x1e   : > { %204 = vst.msk [vmem:[#allocation2] sm:$0xff] %vm203_vm0, %v171_v33  ;;  %v2609_v36 = vld [vmem:[%s2444_s17 + $0x22] sm:$0xff]  ;;  %v2618_v38 = vld [vmem:[%s2444_s17 + $0x30] sm:$0xff]  ;;  %v2632_v41 = vld [vmem:[%s2444_s17 + $0x3a] sm:$0xff] }
  0x1f   : > { %3755 = vst [vmem:[#allocation4_spill] sm:$0xff] %v2609_v36  ;;  %v172_v39 = vld [vmem:[%s2444_s17 + $0x8] sm:$0xff]  ;;  %v2629_v40 = vld [vmem:[%s2444_s17 + $0x32] sm:$0xff]  ;;  %v2643_v44 = vld [vmem:[%s2444_s17 + $0x20] sm:$0xff] }
  0x20   : > { %206 = vst.msk [vmem:[#allocation2 + $0x10] sm:$0xff] %vm203_vm0, %v2615_v37  ;;  %v2636_v43 = vld [vmem:[%s2444_s17 + $0x4a] sm:$0xff]  ;;  %v2646_v45 = vld [vmem:[%s2444_s17 + $0x38] sm:$0xff]  ;;  %v2663_v48 = vld [vmem:[%s2444_s17 + $0x62] sm:$0xff] }
  0x21   : > { %208 = vst.msk [vmem:[#allocation2 + $0x20] sm:$0xff] %vm203_vm0, %v2618_v38  ;;  %v2651_v46 = vld [vmem:[%s2444_s17 + $0x48] sm:$0xff]  ;;  %v2660_v47 = vld [vmem:[%s2444_s17 + $0x52] sm:$0xff]  ;;  %v2677_v52 = vld [vmem:[%s2444_s17 + $0x60] sm:$0xff] }
  0x22   : > { %312 = vrot.lane.b32.xlu0 %v2471_v6, %s2402_s18  ;;  %314 = vrot.lane.b32.xlu1 %v2474_v7, %s2402_s18  ;;  %205 = vst.msk [vmem:[#allocation2 + $0x8] sm:$0xff] %vm203_vm0, %v172_v39  ;;  %v2667_v50 = vld [vmem:[%s2444_s17 + $0x6a] sm:$0xff]  ;;  %v2691_v54 = vld [vmem:[%s2444_s17 + $0x7a] sm:$0xff] }
  0x23   : > { %316 = vrot.lane.b32.xlu2 %v2481_v8, %s2402_s18  ;;  %3756 = vst [vmem:[#allocation5_spill] sm:$0xff] %v2629_v40  ;;  %v2674_v51 = vld [vmem:[%s2444_s17 + $0x50] sm:$0xff]  ;;  %v2682_v53 = vld [vmem:[%s2444_s17 + $0x68] sm:$0xff]  ;;  %v2705_v58 = vld [vmem:[%s2444_s17 + $0x78] sm:$0xff] }
  0x24   : > { %3757 = vst [vmem:[#allocation6_spill] sm:$0xff] %v2632_v41  ;;  %v2694_v55 = vld [vmem:[%s2444_s17 + $0x82] sm:$0xff]  ;;  %v2698_v57 = vld [vmem:[%s2444_s17 + $0x92] sm:$0xff]  ;;  %v2722_v63 = vld [vmem:[%s2444_s17 + $0x9a] sm:$0xff] }
  0x25   : > { %3758 = vst [vmem:[#allocation7_spill] sm:$0xff] %v2636_v43  ;;  %v2708_v59 = vld [vmem:[%s2444_s17 + $0x80] sm:$0xff]  ;;  %v2715_v62 = vld [vmem:[%s2444_s17 + $0x90] sm:$0xff]  ;;  %v2738_v33 = vld [vmem:[%s2444_s17 + $0x98] sm:$0xff] }
  0x26   : > { %207 = vst.msk [vmem:[#allocation2 + $0x18] sm:$0xff] %vm203_vm0, %v2643_v44  ;;  %v2725_v0 = vld [vmem:[%s2444_s17 + $0xaa] sm:$0xff] }
  0x27   : > { %209 = vst.msk [vmem:[#allocation2 + $0x28] sm:$0xff] %vm203_vm0, %v2646_v45 }
  0x28   : > { %210 = vst.msk [vmem:[#allocation2 + $0x30] sm:$0xff] %vm203_vm0, %v2651_v46 }
  0x29   : > { %3759 = vst [vmem:[#allocation8_spill] sm:$0xff] %v2660_v47 }
  0x2a   : > { %318 = vrot.lane.b32.xlu0 %v2486_v9, %s2402_s18  ;;  %320 = vrot.lane.b32.xlu1 %v2489_v10, %s2402_s18  ;;  %3760 = vst [vmem:[#allocation9_spill] sm:$0xff] %v2663_v48 }
  0x2b   : > { %322 = vrot.lane.b32.xlu2 %v2496_v11, %s2402_s18  ;;  %3761 = vst [vmem:[#allocation10_spill] sm:$0xff] %v2667_v50 }
  0x2c   : > { %211 = vst.msk [vmem:[#allocation2 + $0x38] sm:$0xff] %vm203_vm0, %v2674_v51 }
  0x2d   : > { %212 = vst.msk [vmem:[#allocation2 + $0x40] sm:$0xff] %vm203_vm0, %v2677_v52 }
  0x2e   : > { %213 = vst.msk [vmem:[#allocation2 + $0x48] sm:$0xff] %vm203_vm0, %v2682_v53 }
  0x2f   : > { %3762 = vst [vmem:[#allocation11_spill] sm:$0xff] %v2691_v54 }
  0x30   : > { %3763 = vst [vmem:[#allocation12_spill] sm:$0xff] %v2694_v55 }
  0x31   : > { %3764 = vst [vmem:[#allocation13_spill] sm:$0xff] %v2698_v57 }
  0x32   : > { %324 = vrot.lane.b32.xlu0 %v2501_v12, %s2402_s18  ;;  %326 = vrot.lane.b32.xlu1 %v2504_v13, %s2402_s18  ;;  %214 = vst.msk [vmem:[#allocation2 + $0x50] sm:$0xff] %vm203_vm0, %v2705_v58 }
  0x33   : > { %328 = vrot.lane.b32.xlu2 %v2511_v14, %s2402_s18  ;;  %215 = vst.msk [vmem:[#allocation2 + $0x58] sm:$0xff] %vm203_vm0, %v2708_v59 }
  0x34   : > { %3765 = vst [vmem:[#allocation14_spill] sm:$0xff] %v2722_v63 }
  0x35   : > { %3766 = vst [vmem:[#allocation15_spill] sm:$0xff] %v2725_v0 }
  0x36   : > { %216 = vst.msk [vmem:[#allocation2 + $0x60] sm:$0xff] %vm203_vm0, %v2715_v62 }
  0x37   : > { %217 = vst.msk [vmem:[#allocation2 + $0x68] sm:$0xff] %vm203_vm0, %v2738_v33 }
  0x3a   : > { %330 = vrot.lane.b32.xlu0 %v2516_v15, %s2402_s18  ;;  %332 = vrot.lane.b32.xlu1 %v2519_v16, %s2402_s18 }
  0x3b   : > { %334 = vrot.lane.b32.xlu2 %v2526_v17, %s2402_s18 }
  0x42   : > { %336 = vrot.lane.b32.xlu0 %v2531_v18, %s2402_s18  ;;  %338 = vrot.lane.b32.xlu1 %v2534_v19, %s2402_s18 }
  0x43   : > { %340 = vrot.lane.b32.xlu2 %v2541_v20, %s2402_s18 }
  0x4a   : > { %342 = vrot.lane.b32.xlu0 %v2546_v21, %s2402_s18  ;;  %344 = vrot.lane.b32.xlu1 %v2549_v22, %s2402_s18 }
  0x4b   : > { %346 = vrot.lane.b32.xlu2 %v2556_v23, %s2402_s18 }
  0x52   : > { %348 = vrot.lane.b32.xlu0 %v2561_v24, %s2402_s18  ;;  %350 = vrot.lane.b32.xlu1 %v2564_v25, %s2402_s18 }
  0x53   : > { %352 = vrot.lane.b32.xlu2 %v2571_v26, %s2402_s18 }
  0x5a   : > { %354 = vrot.lane.b32.xlu0 %v2576_v27, %s2402_s18  ;;  %356 = vrot.lane.b32.xlu1 %v2579_v28, %s2402_s18 }
  0x5b   : > { %358 = vrot.lane.b32.xlu2 %v2586_v29, %s2402_s18 }
  0x62   : > { %360 = vrot.lane.b32.xlu0 %v2591_v30, %s2402_s18  ;;  %362 = vrot.lane.b32.xlu1 %v2594_v31, %s2402_s18 }
  0x63   : > { %493 = vrot.lane.b32.xlu2 %v429_v32, %s2403_s19  ;;  %v2731_v32 = vld [vmem:[%s2444_s17 + $0xb2] sm:$0xff] }
  0x64   : > { %3767 = vst [vmem:[#allocation16_spill] sm:$0xff] %v2731_v32 }
  0x6a   : > { %495 = vrot.lane.b32.xlu0 %v430_v34, %s2403_s19  ;;  %497 = vrot.lane.b32.xlu1 %v2606_v35, %s2403_s19  ;;  %v2741_v34 = vld [vmem:[%s2444_s17 + $0xa8] sm:$0xff] }
  0x6b   : > { %499 = vrot.lane.b32.xlu2 %v2609_v36, %s2403_s19  ;;  %218 = vst.msk [vmem:[#allocation2 + $0x70] sm:$0xff] %vm203_vm0, %v2741_v34  ;;  %v2896_v36 = vld [vmem:[%s2444_s17 + $0x16a] sm:$0xff] }
  0x6c   : > { %3782 = vst [vmem:[#allocation31_spill] sm:$0xff] %v2896_v36 }
  0x6d   : > { %v309_v42 = vpop.permute.xlu2 %308 }
  0x6e   : > { %401 = vst.msk [vmem:[#allocation2 + $0x20] sm:$0xff] %vm396_vm1, %v309_v42 }
  0x72   : > { %501 = vrot.lane.b32.xlu0 %v2629_v40, %s2403_s19  ;;  %503 = vrot.lane.b32.xlu1 %v2632_v41, %s2403_s19  ;;  %v2880_v41 = vld [vmem:[%s2444_s17 + $0x140] sm:$0xff] }
  0x73   : > { %505 = vrot.lane.b32.xlu2 %v2636_v43, %s2403_s19  ;;  %v2863_v43 = vld [vmem:[%s2444_s17 + $0x142] sm:$0xff]  ;;  %231 = vst.msk [vmem:[#allocation2 + $0xd8] sm:$0xff] %vm203_vm0, %v2880_v41 }
  0x74   : > { %3779 = vst [vmem:[#allocation28_spill] sm:$0xff] %v2863_v43 }
  0x75   : > { %v311_v49 = vpop.permute.xlu2 %310 }
  0x76   : > { %402 = vst.msk [vmem:[#allocation2 + $0x28] sm:$0xff] %vm396_vm1, %v311_v49  ;;  %v2748_v49 = vld [vmem:[%s2444_s17 + $0xb0] sm:$0xff] }
  0x77   : > { %219 = vst.msk [vmem:[#allocation2 + $0x78] sm:$0xff] %vm203_vm0, %v2748_v49 }
  0x7a   : > { %507 = vrot.lane.b32.xlu0 %v2660_v47, %s2403_s19  ;;  %509 = vrot.lane.b32.xlu1 %v2663_v48, %s2403_s19  ;;  %v2847_v48 = vld [vmem:[%s2444_s17 + $0x120] sm:$0xff] }
  0x7b   : > { %511 = vrot.lane.b32.xlu2 %v2667_v50, %s2403_s19  ;;  %v2830_v50 = vld [vmem:[%s2444_s17 + $0x122] sm:$0xff]  ;;  %228 = vst.msk [vmem:[#allocation2 + $0xc0] sm:$0xff] %vm203_vm0, %v2847_v48 }
  0x7c   : > { %3776 = vst [vmem:[#allocation25_spill] sm:$0xff] %v2830_v50 }
  0x7d   : > { %v317_v56 = vpop.permute.xlu2 %316 }
  0x7e   : > { %405 = vst.msk [vmem:[#allocation2 + $0x40] sm:$0xff] %vm396_vm1, %v317_v56  ;;  %v2755_v56 = vld [vmem:[%s2444_s17 + $0xc2] sm:$0xff] }
  0x7f   : > { %3768 = vst [vmem:[#allocation17_spill] sm:$0xff] %v2755_v56 }
  0x82   : > { %513 = vrot.lane.b32.xlu0 %v2691_v54, %s2403_s19  ;;  %515 = vrot.lane.b32.xlu1 %v2694_v55, %s2403_s19  ;;  %v2814_v55 = vld [vmem:[%s2444_s17 + $0xf8] sm:$0xff] }
  0x83   : > { %517 = vrot.lane.b32.xlu2 %v2698_v57, %s2403_s19  ;;  %v2797_v57 = vld [vmem:[%s2444_s17 + $0xfa] sm:$0xff]  ;;  %225 = vst.msk [vmem:[#allocation2 + $0xa8] sm:$0xff] %vm203_vm0, %v2814_v55 }
  0x84   : > { %v301_v60 = vpop.permute.xlu0 %300  ;;  %v305_v61 = vpop.permute.xlu1 %304  ;;  %3773 = vst [vmem:[#allocation22_spill] sm:$0xff] %v2797_v57 }
  0x85   : > { %397 = vst.msk [vmem:[#allocation2] sm:$0xff] %vm396_vm1, %v301_v60  ;;  %v323_v3 = vpop.permute.xlu2 %322  ;;  %v2758_v60 = vld [vmem:[%s2444_s17 + $0xca] sm:$0xff] }
  0x86   : > { %399 = vst.msk [vmem:[#allocation2 + $0x10] sm:$0xff] %vm396_vm1, %v305_v61 }
  0x87   : > { %408 = vst.msk [vmem:[#allocation2 + $0x58] sm:$0xff] %vm396_vm1, %v323_v3  ;;  %v2764_v3 = vld [vmem:[%s2444_s17 + $0xda] sm:$0xff] }
  0x88   : > { %3769 = vst [vmem:[#allocation18_spill] sm:$0xff] %v2758_v60 }
  0x89   : > { %3770 = vst [vmem:[#allocation19_spill] sm:$0xff] %v2764_v3 }
  0x8a   : > { %519 = vrot.lane.b32.xlu0 %v2722_v63, %s2403_s19  ;;  %521 = vrot.lane.b32.xlu1 %v2725_v0, %s2403_s19  ;;  %v2781_v0 = vld [vmem:[%s2444_s17 + $0xd8] sm:$0xff] }
  0x8b   : > { %523 = vrot.lane.b32.xlu2 %v2731_v32, %s2403_s19  ;;  %222 = vst.msk [vmem:[#allocation2 + $0x90] sm:$0xff] %vm203_vm0, %v2781_v0 }
  0x8c   : > { %v303_v39 = vpop.permute.xlu0 %302  ;;  %v307_v42 = vpop.permute.xlu1 %306 }
  0x8d   : > { %398 = vst.msk [vmem:[#allocation2 + $0x8] sm:$0xff] %vm396_vm1, %v303_v39  ;;  %v329_v61 = vpop.permute.xlu2 %328  ;;  %v2771_v39 = vld [vmem:[%s2444_s17 + $0xc0] sm:$0xff] }
  0x8e   : > { %400 = vst.msk [vmem:[#allocation2 + $0x18] sm:$0xff] %vm396_vm1, %v307_v42  ;;  %v2774_v42 = vld [vmem:[%s2444_s17 + $0xc8] sm:$0xff] }
  0x8f   : > { %411 = vst.msk [vmem:[#allocation2 + $0x70] sm:$0xff] %vm396_vm1, %v329_v61 }
  0x90   : > { %220 = vst.msk [vmem:[#allocation2 + $0x80] sm:$0xff] %vm203_vm0, %v2771_v39 }
  0x91   : > { %221 = vst.msk [vmem:[#allocation2 + $0x88] sm:$0xff] %vm203_vm0, %v2774_v42 }
  0x92   : > { %525 = vrot.lane.b32.xlu0 %v2755_v56, %s2403_s19  ;;  %527 = vrot.lane.b32.xlu1 %v2758_v60, %s2403_s19  ;;  %v2788_v60 = vld [vmem:[%s2444_s17 + $0xe2] sm:$0xff]  ;;  %v2791_v56 = vld [vmem:[%s2444_s17 + $0xf2] sm:$0xff] }
  0x93   : > { %529 = vrot.lane.b32.xlu2 %v2764_v3, %s2403_s19  ;;  %3771 = vst [vmem:[#allocation20_spill] sm:$0xff] %v2788_v60 }
  0x94   : > { %v313_v32 = vpop.permute.xlu0 %312  ;;  %v315_v61 = vpop.permute.xlu1 %314  ;;  %3772 = vst [vmem:[#allocation21_spill] sm:$0xff] %v2791_v56 }
  0x95   : > { %403 = vst.msk [vmem:[#allocation2 + $0x30] sm:$0xff] %vm396_vm1, %v313_v32  ;;  %v335_v63 = vpop.permute.xlu2 %334  ;;  %v2804_v32 = vld [vmem:[%s2444_s17 + $0xe0] sm:$0xff] }
  0x96   : > { %404 = vst.msk [vmem:[#allocation2 + $0x38] sm:$0xff] %vm396_vm1, %v315_v61  ;;  %v2807_v61 = vld [vmem:[%s2444_s17 + $0xf0] sm:$0xff] }
  0x97   : > { %414 = vst.msk [vmem:[#allocation2 + $0x88] sm:$0xff] %vm396_vm1, %v335_v63 }
  0x98   : > { %223 = vst.msk [vmem:[#allocation2 + $0x98] sm:$0xff] %vm203_vm0, %v2804_v32 }
  0x99   : > { %224 = vst.msk [vmem:[#allocation2 + $0xa0] sm:$0xff] %vm203_vm0, %v2807_v61 }
  0x9a   : > { %531 = vrot.lane.b32.xlu0 %v2788_v60, %s2403_s19  ;;  %533 = vrot.lane.b32.xlu1 %v2791_v56, %s2403_s19  ;;  %v2821_v56 = vld [vmem:[%s2444_s17 + $0x10a] sm:$0xff]  ;;  %v2824_v60 = vld [vmem:[%s2444_s17 + $0x112] sm:$0xff] }
  0x9b   : > { %535 = vrot.lane.b32.xlu2 %v2797_v57, %s2403_s19  ;;  %3774 = vst [vmem:[#allocation23_spill] sm:$0xff] %v2821_v56 }
  0x9c   : > { %v319_v3 = vpop.permute.xlu0 %318  ;;  %v321_v63 = vpop.permute.xlu1 %320  ;;  %3775 = vst [vmem:[#allocation24_spill] sm:$0xff] %v2824_v60 }
  0x9d   : > { %406 = vst.msk [vmem:[#allocation2 + $0x48] sm:$0xff] %vm396_vm1, %v319_v3  ;;  %v341_v54 = vpop.permute.xlu2 %340  ;;  %v2837_v3 = vld [vmem:[%s2444_s17 + $0x108] sm:$0xff] }
  0x9e   : > { %407 = vst.msk [vmem:[#allocation2 + $0x50] sm:$0xff] %vm396_vm1, %v321_v63  ;;  %v2840_v63 = vld [vmem:[%s2444_s17 + $0x110] sm:$0xff] }
  0x9f   : > { %417 = vst.msk [vmem:[#allocation2 + $0xa0] sm:$0xff] %vm396_vm1, %v341_v54 }
  0xa0   : > { %226 = vst.msk [vmem:[#allocation2 + $0xb0] sm:$0xff] %vm203_vm0, %v2837_v3 }
  0xa1   : > { %227 = vst.msk [vmem:[#allocation2 + $0xb8] sm:$0xff] %vm203_vm0, %v2840_v63 }
  0xa2   : > { %537 = vrot.lane.b32.xlu0 %v2821_v56, %s2403_s19  ;;  %539 = vrot.lane.b32.xlu1 %v2824_v60, %s2403_s19  ;;  %v2854_v60 = vld [vmem:[%s2444_s17 + $0x12a] sm:$0xff]  ;;  %v2857_v56 = vld [vmem:[%s2444_s17 + $0x13a] sm:$0xff] }
  0xa3   : > { %541 = vrot.lane.b32.xlu2 %v2830_v50, %s2403_s19  ;;  %3777 = vst [vmem:[#allocation26_spill] sm:$0xff] %v2854_v60 }
  0xa4   : > { %v325_v57 = vpop.permute.xlu0 %324  ;;  %v327_v54 = vpop.permute.xlu1 %326  ;;  %3778 = vst [vmem:[#allocation27_spill] sm:$0xff] %v2857_v56 }
  0xa5   : > { %409 = vst.msk [vmem:[#allocation2 + $0x60] sm:$0xff] %vm396_vm1, %v325_v57  ;;  %v347_v47 = vpop.permute.xlu2 %346  ;;  %v2870_v57 = vld [vmem:[%s2444_s17 + $0x128] sm:$0xff] }
  0xa6   : > { %410 = vst.msk [vmem:[#allocation2 + $0x68] sm:$0xff] %vm396_vm1, %v327_v54  ;;  %v2873_v54 = vld [vmem:[%s2444_s17 + $0x138] sm:$0xff] }
  0xa7   : > { %420 = vst.msk [vmem:[#allocation2 + $0xb8] sm:$0xff] %vm396_vm1, %v347_v47 }
  0xa8   : > { %229 = vst.msk [vmem:[#allocation2 + $0xc8] sm:$0xff] %vm203_vm0, %v2870_v57 }
  0xa9   : > { %230 = vst.msk [vmem:[#allocation2 + $0xd0] sm:$0xff] %vm203_vm0, %v2873_v54 }
  0xaa   : > { %543 = vrot.lane.b32.xlu0 %v2854_v60, %s2403_s19  ;;  %545 = vrot.lane.b32.xlu1 %v2857_v56, %s2403_s19  ;;  %v2887_v56 = vld [vmem:[%s2444_s17 + $0x152] sm:$0xff]  ;;  %v2890_v60 = vld [vmem:[%s2444_s17 + $0x15a] sm:$0xff] }
  0xab   : > { %547 = vrot.lane.b32.xlu2 %v2863_v43, %s2403_s19  ;;  %3780 = vst [vmem:[#allocation29_spill] sm:$0xff] %v2887_v56 }
  0xac   : > { %v331_v50 = vpop.permute.xlu0 %330  ;;  %v333_v47 = vpop.permute.xlu1 %332  ;;  %3781 = vst [vmem:[#allocation30_spill] sm:$0xff] %v2890_v60 }
  0xad   : > { %412 = vst.msk [vmem:[#allocation2 + $0x78] sm:$0xff] %vm396_vm1, %v331_v50  ;;  %v353_v40 = vpop.permute.xlu2 %352  ;;  %v2903_v50 = vld [vmem:[%s2444_s17 + $0x150] sm:$0xff] }
  0xae   : > { %413 = vst.msk [vmem:[#allocation2 + $0x80] sm:$0xff] %vm396_vm1, %v333_v47  ;;  %v2906_v47 = vld [vmem:[%s2444_s17 + $0x158] sm:$0xff] }
  0xaf   : > { %423 = vst.msk [vmem:[#allocation2 + $0xd0] sm:$0xff] %vm396_vm1, %v353_v40  ;;  %v2913_v40 = vld [vmem:[%s2444_s17 + $0x168] sm:$0xff] }
  0xb0   : > { %232 = vst.msk [vmem:[#allocation2 + $0xe0] sm:$0xff] %vm203_vm0, %v2903_v50 }
  0xb1   : > { %233 = vst.msk [vmem:[#allocation2 + $0xe8] sm:$0xff] %vm203_vm0, %v2906_v47 }
  0xb2   : > { %549 = vrot.lane.b32.xlu0 %v2887_v56, %s2403_s19  ;;  %551 = vrot.lane.b32.xlu1 %v2890_v60, %s2403_s19  ;;  %v2920_v60 = vld [vmem:[%s2444_s17 + $0x172] sm:$0xff]  ;;  %234 = vst.msk [vmem:[#allocation2 + $0xf0] sm:$0xff] %vm203_vm0, %v2913_v40 }
  0xb3   : > { %553 = vrot.lane.b32.xlu2 %v2896_v36, %s2403_s19  ;;  %3783 = vst [vmem:[#allocation32_spill] sm:$0xff] %v2920_v60 }
  0xb4   : > { %v337_v43 = vpop.permute.xlu0 %336  ;;  %v339_v35 = vpop.permute.xlu1 %338 }
  0xb5   : > { %415 = vst.msk [vmem:[#allocation2 + $0x90] sm:$0xff] %vm396_vm1, %v337_v43  ;;  %v359_v56 = vpop.permute.xlu2 %358  ;;  %v2930_v43 = vld [vmem:[%s2444_s17 + $0x170] sm:$0xff] }
  0xb6   : > { %416 = vst.msk [vmem:[#allocation2 + $0x98] sm:$0xff] %vm396_vm1, %v339_v35 }
  0xb7   : > { %426 = vst.msk [vmem:[#allocation2 + $0xe8] sm:$0xff] %vm396_vm1, %v359_v56 }
  0xb8   : > { %235 = vst.msk [vmem:[#allocation2 + $0xf8] sm:$0xff] %vm203_vm0, %v2930_v43 }
  0xba   : > { %555 = vrot.lane.b32.xlu0 %v2920_v60, %s2403_s19  ;;  %687 = vrot.lane.b32.xlu1 %v2615_v37, %s2404_s20 }
  0xbb   : > { %689 = vrot.lane.b32.xlu2 %v2643_v44, %s2404_s20 }
  0xbc   : > { %v343_v35 = vpop.permute.xlu0 %342  ;;  %v345_v36 = vpop.permute.xlu1 %344 }
  0xbd   : > { %418 = vst.msk [vmem:[#allocation2 + $0xa8] sm:$0xff] %vm396_vm1, %v343_v35  ;;  %v494_v56 = vpop.permute.xlu2 %493 }
  0xbe   : > { %419 = vst.msk [vmem:[#allocation2 + $0xb0] sm:$0xff] %vm396_vm1, %v345_v36 }
  0xbf   : > { %590 = vst.msk [vmem:[#allocation2] sm:$0xff] %vm589_vm2, %v494_v56 }
  0xc2   : > { %691 = vrot.lane.b32.xlu0 %v2618_v38, %s2404_s20  ;;  %693 = vrot.lane.b32.xlu1 %v2646_v45, %s2404_s20 }
  0xc3   : > { %695 = vrot.lane.b32.xlu2 %v2651_v46, %s2404_s20 }
  0xc4   : > { %v349_v37 = vpop.permute.xlu0 %348  ;;  %v351_v60 = vpop.permute.xlu1 %350 }
  0xc5   : > { %421 = vst.msk [vmem:[#allocation2 + $0xc0] sm:$0xff] %vm396_vm1, %v349_v37  ;;  %v500_v44 = vpop.permute.xlu2 %499 }
  0xc6   : > { %422 = vst.msk [vmem:[#allocation2 + $0xc8] sm:$0xff] %vm396_vm1, %v351_v60 }
  0xc7   : > { %593 = vst.msk [vmem:[#allocation2 + $0x18] sm:$0xff] %vm589_vm2, %v500_v44 }
  0xca   : > { %697 = vrot.lane.b32.xlu0 %v2674_v51, %s2404_s20  ;;  %699 = vrot.lane.b32.xlu1 %v2677_v52, %s2404_s20 }
  0xcb   : > { %701 = vrot.lane.b32.xlu2 %v2682_v53, %s2404_s20 }
  0xcc   : > { %v355_v36 = vpop.permute.xlu0 %354  ;;  %v357_v38 = vpop.permute.xlu1 %356 }
  0xcd   : > { %424 = vst.msk [vmem:[#allocation2 + $0xd8] sm:$0xff] %vm396_vm1, %v355_v36  ;;  %v506_v45 = vpop.permute.xlu2 %505 }
  0xce   : > { %425 = vst.msk [vmem:[#allocation2 + $0xe0] sm:$0xff] %vm396_vm1, %v357_v38 }
  0xcf   : > { %596 = vst.msk [vmem:[#allocation2 + $0x30] sm:$0xff] %vm589_vm2, %v506_v45 }
  0xd2   : > { %703 = vrot.lane.b32.xlu0 %v2705_v58, %s2404_s20  ;;  %705 = vrot.lane.b32.xlu1 %v2708_v59, %s2404_s20 }
  0xd3   : > { %707 = vrot.lane.b32.xlu2 %v2715_v62, %s2404_s20 }
  0xd4   : > { %v361_v60 = vpop.permute.xlu0 %360  ;;  %v363_v52 = vpop.permute.xlu1 %362 }
  0xd5   : > { %427 = vst.msk [vmem:[#allocation2 + $0xf0] sm:$0xff] %vm396_vm1, %v361_v60  ;;  %v512_v35 = vpop.permute.xlu2 %511 }
  0xd6   : > { %428 = vst.msk [vmem:[#allocation2 + $0xf8] sm:$0xff] %vm396_vm1, %v363_v52 }
  0xd7   : > { %599 = vst.msk [vmem:[#allocation2 + $0x48] sm:$0xff] %vm589_vm2, %v512_v35  ;;  %v3025_v35 = vld [vmem:[%s2444_s17 + $0x188] sm:$0xff] }
  0xda   : > { %709 = vrot.lane.b32.xlu0 %v2738_v33, %s2404_s20  ;;  %711 = vrot.lane.b32.xlu1 %v2741_v34, %s2404_s20 }
  0xdb   : > { %713 = vrot.lane.b32.xlu2 %v2748_v49, %s2404_s20 }
  0xdc   : > { %v496_v56 = vpop.permute.xlu0 %495  ;;  %v498_v59 = vpop.permute.xlu1 %497 }
  0xdd   : > { %591 = vst.msk [vmem:[#allocation2 + $0x8] sm:$0xff] %vm589_vm2, %v496_v56  ;;  %v518_v37 = vpop.permute.xlu2 %517 }
  0xde   : > { %592 = vst.msk [vmem:[#allocation2 + $0x10] sm:$0xff] %vm589_vm2, %v498_v59 }
  0xdf   : > { %602 = vst.msk [vmem:[#allocation2 + $0x60] sm:$0xff] %vm589_vm2, %v518_v37 }
  0xe2   : > { %715 = vrot.lane.b32.xlu0 %v2771_v39, %s2404_s20  ;;  %717 = vrot.lane.b32.xlu1 %v2774_v42, %s2404_s20 }
  0xe3   : > { %719 = vrot.lane.b32.xlu2 %v2781_v0, %s2404_s20 }
  0xe4   : > { %v502_v44 = vpop.permute.xlu0 %501  ;;  %v504_v34 = vpop.permute.xlu1 %503 }
  0xe5   : > { %594 = vst.msk [vmem:[#allocation2 + $0x20] sm:$0xff] %vm589_vm2, %v502_v44  ;;  %v524_v36 = vpop.permute.xlu2 %523 }
  0xe6   : > { %595 = vst.msk [vmem:[#allocation2 + $0x28] sm:$0xff] %vm589_vm2, %v504_v34 }
  0xe7   : > { %605 = vst.msk [vmem:[#allocation2 + $0x78] sm:$0xff] %vm589_vm2, %v524_v36  ;;  %v3125_v36 = vld [vmem:[%s2444_s17 + $0x189] sm:$0xff] }
  0xea   : > { %721 = vrot.lane.b32.xlu0 %v2804_v32, %s2404_s20  ;;  %723 = vrot.lane.b32.xlu1 %v2807_v61, %s2404_s20 }
  0xeb   : > { %725 = vrot.lane.b32.xlu2 %v2814_v55, %s2404_s20 }
  0xec   : > { %v508_v38 = vpop.permute.xlu0 %507  ;;  %v510_v42 = vpop.permute.xlu1 %509 }
  0xed   : > { %597 = vst.msk [vmem:[#allocation2 + $0x38] sm:$0xff] %vm589_vm2, %v508_v38  ;;  %v530_v45 = vpop.permute.xlu2 %529 }
  0xee   : > { %598 = vst.msk [vmem:[#allocation2 + $0x40] sm:$0xff] %vm589_vm2, %v510_v42 }
  0xef   : > { %608 = vst.msk [vmem:[#allocation2 + $0x90] sm:$0xff] %vm589_vm2, %v530_v45  ;;  %v3785_v45 = vld [vmem:[#allocation4_spill] sm:$0xff] }
  0xf2   : > { %727 = vrot.lane.b32.xlu0 %v2837_v3, %s2404_s20  ;;  %729 = vrot.lane.b32.xlu1 %v2840_v63, %s2404_s20 }
  0xf3   : > { %731 = vrot.lane.b32.xlu2 %v2847_v48, %s2404_s20 }
  0xf4   : > { %v514_v60 = vpop.permute.xlu0 %513  ;;  %v516_v61 = vpop.permute.xlu1 %515 }
  0xf5   : > { %600 = vst.msk [vmem:[#allocation2 + $0x50] sm:$0xff] %vm589_vm2, %v514_v60  ;;  %v536_v55 = vpop.permute.xlu2 %535  ;;  %v3786_v60 = vld [vmem:[#allocation5_spill] sm:$0xff] }
  0xf6   : > { %601 = vst.msk [vmem:[#allocation2 + $0x58] sm:$0xff] %vm589_vm2, %v516_v61 }
  0xf7   : > { %611 = vst.msk [vmem:[#allocation2 + $0xa8] sm:$0xff] %vm589_vm2, %v536_v55 }
  0xfa   : > { %733 = vrot.lane.b32.xlu0 %v2870_v57, %s2404_s20  ;;  %735 = vrot.lane.b32.xlu1 %v2873_v54, %s2404_s20 }
  0xfb   : > { %737 = vrot.lane.b32.xlu2 %v2880_v41, %s2404_s20  ;;  %v2163_v41 = vld [vmem:[%s2444_s17 + $0x180] sm:$0xff] }
  0xfc   : > { %v520_v3 = vpop.permute.xlu0 %519  ;;  %v522_v63 = vpop.permute.xlu1 %521 }
  0xfd   : > { %603 = vst.msk [vmem:[#allocation2 + $0x68] sm:$0xff] %vm589_vm2, %v520_v3  ;;  %v542_v48 = vpop.permute.xlu2 %541  ;;  %v3787_v3 = vld [vmem:[#allocation6_spill] sm:$0xff] }
  0xfe   : > { %604 = vst.msk [vmem:[#allocation2 + $0x70] sm:$0xff] %vm589_vm2, %v522_v63 }
  0xff   : > { %614 = vst.msk [vmem:[#allocation2 + $0xc0] sm:$0xff] %vm589_vm2, %v542_v48  ;;  %v3788_v48 = vld [vmem:[#allocation7_spill] sm:$0xff] }
 0x102   : > { %739 = vrot.lane.b32.xlu0 %v2903_v50, %s2404_s20  ;;  %741 = vrot.lane.b32.xlu1 %v2906_v47, %s2404_s20 }
 0x103   : > { %743 = vrot.lane.b32.xlu2 %v2913_v40, %s2404_s20 }
 0x104   : > { %v526_v57 = vpop.permute.xlu0 %525  ;;  %v528_v54 = vpop.permute.xlu1 %527 }
 0x105   : > { %606 = vst.msk [vmem:[#allocation2 + $0x80] sm:$0xff] %vm589_vm2, %v526_v57  ;;  %v548_v52 = vpop.permute.xlu2 %547  ;;  %v3789_v57 = vld [vmem:[#allocation8_spill] sm:$0xff] }
 0x106   : > { %607 = vst.msk [vmem:[#allocation2 + $0x88] sm:$0xff] %vm589_vm2, %v528_v54 }
 0x107   : > { %617 = vst.msk [vmem:[#allocation2 + $0xd8] sm:$0xff] %vm589_vm2, %v548_v52  ;;  %v3790_v52 = vld [vmem:[#allocation9_spill] sm:$0xff] }
 0x10a   : > { %745 = vrot.lane.b32.xlu0 %v2930_v43, %s2404_s20  ;;  %747 = vrot.lane.b32.xlu1 %v2163_v41, %s2404_s20 }
 0x10b   : > { %749 = vrot.lane.b32.xlu2 %v3025_v35, %s2404_s20 }
 0x10c   : > { %v532_v56 = vpop.permute.xlu0 %531  ;;  %v534_v59 = vpop.permute.xlu1 %533 }
 0x10d   : > { %609 = vst.msk [vmem:[#allocation2 + $0x98] sm:$0xff] %vm589_vm2, %v532_v56  ;;  %v554_v37 = vpop.permute.xlu2 %553 }
 0x10e   : > { %610 = vst.msk [vmem:[#allocation2 + $0xa0] sm:$0xff] %vm589_vm2, %v534_v59  ;;  %v3791_v59 = vld [vmem:[#allocation10_spill] sm:$0xff] }
 0x10f   : > { %620 = vst.msk [vmem:[#allocation2 + $0xf0] sm:$0xff] %vm589_vm2, %v554_v37  ;;  %v3792_v37 = vld [vmem:[#allocation11_spill] sm:$0xff] }
 0x112   : > { %880 = vrot.lane.b32.xlu0 %v2448_v1, %s2405_s21  ;;  %882 = vrot.lane.b32.xlu1 %v2460_v4, %s2405_s21 }
 0x113   : > { %884 = vrot.lane.b32.xlu2 %v2454_v2, %s2405_s21 }
 0x114   : > { %v538_v43 = vpop.permute.xlu0 %537  ;;  %v540_v44 = vpop.permute.xlu1 %539 }
 0x115   : > { %612 = vst.msk [vmem:[#allocation2 + $0xb0] sm:$0xff] %vm589_vm2, %v538_v43  ;;  %v690_v34 = vpop.permute.xlu2 %689 }
 0x116   : > { %613 = vst.msk [vmem:[#allocation2 + $0xb8] sm:$0xff] %vm589_vm2, %v540_v44 }
 0x117   : > { %785 = vst.msk [vmem:[#allocation2 + $0x8] sm:$0xff] %vm783_vm3, %v690_v34  ;;  %v3793_v34 = vld [vmem:[#allocation12_spill] sm:$0xff] }
 0x11a   : > { %886 = vrot.lane.b32.xlu0 %v2466_v5, %s2405_s21  ;;  %888 = vrot.lane.b32.xlu1 %v2471_v6, %s2405_s21 }
 0x11b   : > { %890 = vrot.lane.b32.xlu2 %v2474_v7, %s2405_s21 }
 0x11c   : > { %v544_v1 = vpop.permute.xlu0 %543  ;;  %v546_v4 = vpop.permute.xlu1 %545 }
 0x11d   : > { %615 = vst.msk [vmem:[#allocation2 + $0xc8] sm:$0xff] %vm589_vm2, %v544_v1  ;;  %v696_v2 = vpop.permute.xlu2 %695 }
 0x11e   : > { %616 = vst.msk [vmem:[#allocation2 + $0xd0] sm:$0xff] %vm589_vm2, %v546_v4  ;;  %v3794_v4 = vld [vmem:[#allocation13_spill] sm:$0xff] }
 0x11f   : > { %788 = vst.msk [vmem:[#allocation2 + $0x20] sm:$0xff] %vm783_vm3, %v696_v2  ;;  %v3795_v2 = vld [vmem:[#allocation14_spill] sm:$0xff] }
 0x122   : > { %892 = vrot.lane.b32.xlu0 %v2481_v8, %s2405_s21  ;;  %894 = vrot.lane.b32.xlu1 %v2486_v9, %s2405_s21 }
 0x123   : > { %896 = vrot.lane.b32.xlu2 %v2489_v10, %s2405_s21 }
 0x124   : > { %v550_v5 = vpop.permute.xlu0 %549  ;;  %v552_v6 = vpop.permute.xlu1 %551 }
 0x125   : > { %618 = vst.msk [vmem:[#allocation2 + $0xe0] sm:$0xff] %vm589_vm2, %v550_v5  ;;  %v702_v7 = vpop.permute.xlu2 %701 }
 0x126   : > { %619 = vst.msk [vmem:[#allocation2 + $0xe8] sm:$0xff] %vm589_vm2, %v552_v6 }
 0x127   : > { %791 = vst.msk [vmem:[#allocation2 + $0x38] sm:$0xff] %vm783_vm3, %v702_v7  ;;  %v3796_v7 = vld [vmem:[#allocation15_spill] sm:$0xff] }
 0x12a   : > { %898 = vrot.lane.b32.xlu0 %v2496_v11, %s2405_s21  ;;  %900 = vrot.lane.b32.xlu1 %v2501_v12, %s2405_s21 }
 0x12b   : > { %902 = vrot.lane.b32.xlu2 %v2504_v13, %s2405_s21 }
 0x12c   : > { %v556_v8 = vpop.permute.xlu0 %555  ;;  %v688_v9 = vpop.permute.xlu1 %687 }
 0x12d   : > { %621 = vst.msk [vmem:[#allocation2 + $0xf8] sm:$0xff] %vm589_vm2, %v556_v8  ;;  %v708_v10 = vpop.permute.xlu2 %707 }
 0x12e   : > { %784 = vst.msk [vmem:[#allocation2] sm:$0xff] %vm783_vm3, %v688_v9  ;;  %v3797_v9 = vld [vmem:[#allocation16_spill] sm:$0xff] }
 0x12f   : > { %794 = vst.msk [vmem:[#allocation2 + $0x50] sm:$0xff] %vm783_vm3, %v708_v10  ;;  %v3798_v10 = vld [vmem:[#allocation17_spill] sm:$0xff] }
 0x132   : > { %904 = vrot.lane.b32.xlu0 %v2511_v14, %s2405_s21  ;;  %906 = vrot.lane.b32.xlu1 %v2516_v15, %s2405_s21 }
 0x133   : > { %908 = vrot.lane.b32.xlu2 %v2519_v16, %s2405_s21 }
 0x134   : > { %v692_v11 = vpop.permute.xlu0 %691  ;;  %v694_v12 = vpop.permute.xlu1 %693 }
 0x135   : > { %786 = vst.msk [vmem:[#allocation2 + $0x10] sm:$0xff] %vm783_vm3, %v692_v11  ;;  %v714_v13 = vpop.permute.xlu2 %713 }
 0x136   : > { %787 = vst.msk [vmem:[#allocation2 + $0x18] sm:$0xff] %vm783_vm3, %v694_v12 }
 0x137   : > { %797 = vst.msk [vmem:[#allocation2 + $0x68] sm:$0xff] %vm783_vm3, %v714_v13  ;;  %v3799_v13 = vld [vmem:[#allocation18_spill] sm:$0xff] }
 0x13a   : > { %910 = vrot.lane.b32.xlu0 %v2526_v17, %s2405_s21  ;;  %912 = vrot.lane.b32.xlu1 %v2531_v18, %s2405_s21 }
 0x13b   : > { %914 = vrot.lane.b32.xlu2 %v2534_v19, %s2405_s21 }
 0x13c   : > { %v698_v14 = vpop.permute.xlu0 %697  ;;  %v700_v15 = vpop.permute.xlu1 %699 }
 0x13d   : > { %789 = vst.msk [vmem:[#allocation2 + $0x28] sm:$0xff] %vm783_vm3, %v698_v14  ;;  %v720_v16 = vpop.permute.xlu2 %719 }
 0x13e   : > { %790 = vst.msk [vmem:[#allocation2 + $0x30] sm:$0xff] %vm783_vm3, %v700_v15  ;;  %v3800_v15 = vld [vmem:[#allocation19_spill] sm:$0xff] }
 0x13f   : > { %800 = vst.msk [vmem:[#allocation2 + $0x80] sm:$0xff] %vm783_vm3, %v720_v16  ;;  %v3801_v16 = vld [vmem:[#allocation20_spill] sm:$0xff] }
 0x142   : > { %916 = vrot.lane.b32.xlu0 %v2541_v20, %s2405_s21  ;;  %918 = vrot.lane.b32.xlu1 %v2546_v21, %s2405_s21 }
 0x143   : > { %920 = vrot.lane.b32.xlu2 %v2549_v22, %s2405_s21 }
 0x144   : > { %v704_v17 = vpop.permute.xlu0 %703  ;;  %v706_v18 = vpop.permute.xlu1 %705 }
 0x145   : > { %792 = vst.msk [vmem:[#allocation2 + $0x40] sm:$0xff] %vm783_vm3, %v704_v17  ;;  %v726_v19 = vpop.permute.xlu2 %725 }
 0x146   : > { %793 = vst.msk [vmem:[#allocation2 + $0x48] sm:$0xff] %vm783_vm3, %v706_v18 }
 0x147   : > { %803 = vst.msk [vmem:[#allocation2 + $0x98] sm:$0xff] %vm783_vm3, %v726_v19  ;;  %v3802_v19 = vld [vmem:[#allocation21_spill] sm:$0xff] }
 0x14a   : > { %922 = vrot.lane.b32.xlu0 %v2556_v23, %s2405_s21  ;;  %924 = vrot.lane.b32.xlu1 %v2561_v24, %s2405_s21 }
 0x14b   : > { %926 = vrot.lane.b32.xlu2 %v2564_v25, %s2405_s21 }
 0x14c   : > { %v710_v20 = vpop.permute.xlu0 %709  ;;  %v712_v21 = vpop.permute.xlu1 %711 }
 0x14d   : > { %795 = vst.msk [vmem:[#allocation2 + $0x58] sm:$0xff] %vm783_vm3, %v710_v20  ;;  %v732_v22 = vpop.permute.xlu2 %731 }
 0x14e   : > { %796 = vst.msk [vmem:[#allocation2 + $0x60] sm:$0xff] %vm783_vm3, %v712_v21  ;;  %v3803_v21 = vld [vmem:[#allocation22_spill] sm:$0xff] }
 0x14f   : > { %806 = vst.msk [vmem:[#allocation2 + $0xb0] sm:$0xff] %vm783_vm3, %v732_v22  ;;  %v3804_v22 = vld [vmem:[#allocation23_spill] sm:$0xff] }
 0x152   : > { %928 = vrot.lane.b32.xlu0 %v2571_v26, %s2405_s21  ;;  %930 = vrot.lane.b32.xlu1 %v2576_v27, %s2405_s21 }
 0x153   : > { %932 = vrot.lane.b32.xlu2 %v2579_v28, %s2405_s21  ;;  %v3122_v28 = vld [vmem:[%s2444_s17 + $0x181] sm:$0xff] }
 0x154   : > { %v716_v23 = vpop.permute.xlu0 %715  ;;  %v718_v24 = vpop.permute.xlu1 %717 }
 0x155   : > { %798 = vst.msk [vmem:[#allocation2 + $0x70] sm:$0xff] %vm783_vm3, %v716_v23  ;;  %v738_v25 = vpop.permute.xlu2 %737 }
 0x156   : > { %799 = vst.msk [vmem:[#allocation2 + $0x78] sm:$0xff] %vm783_vm3, %v718_v24 }
 0x157   : > { %809 = vst.msk [vmem:[#allocation2 + $0xc8] sm:$0xff] %vm783_vm3, %v738_v25  ;;  %v3805_v25 = vld [vmem:[#allocation24_spill] sm:$0xff] }
 0x15a   : > { %934 = vrot.lane.b32.xlu0 %v2586_v29, %s2405_s21  ;;  %936 = vrot.lane.b32.xlu1 %v2591_v30, %s2405_s21 }
 0x15b   : > { %938 = vrot.lane.b32.xlu2 %v2594_v31, %s2405_s21  ;;  %v3784_v31 = vld [vmem:[#allocation3_spill] sm:$0xff] }
 0x15c   : > { %v722_v26 = vpop.permute.xlu0 %721  ;;  %v724_v27 = vpop.permute.xlu1 %723 }
 0x15d   : > { %801 = vst.msk [vmem:[#allocation2 + $0x88] sm:$0xff] %vm783_vm3, %v722_v26  ;;  %v744_v38 = vpop.permute.xlu2 %743 }
 0x15e   : > { %802 = vst.msk [vmem:[#allocation2 + $0x90] sm:$0xff] %vm783_vm3, %v724_v27  ;;  %v3806_v27 = vld [vmem:[#allocation25_spill] sm:$0xff] }
 0x15f   : > { %812 = vst.msk [vmem:[#allocation2 + $0xe0] sm:$0xff] %vm783_vm3, %v744_v38  ;;  %v3807_v38 = vld [vmem:[#allocation26_spill] sm:$0xff] }
 0x162   : > { %940 = vrot.lane.b32.xlu0 %v3122_v28, %s2405_s21  ;;  %942 = vrot.lane.b32.xlu1 %v3125_v36, %s2405_s21 }
 0x163   : > { %1073 = vrot.lane.b32.xlu2 %v3784_v31, %s2406_s22  ;;  %v3808_v31 = vld [vmem:[#allocation27_spill] sm:$0xff] }
 0x164   : > { %v728_v29 = vpop.permute.xlu0 %727  ;;  %v730_v30 = vpop.permute.xlu1 %729 }
 0x165   : > { %804 = vst.msk [vmem:[#allocation2 + $0xa0] sm:$0xff] %vm783_vm3, %v728_v29  ;;  %v750_v42 = vpop.permute.xlu2 %749 }
 0x166   : > { %805 = vst.msk [vmem:[#allocation2 + $0xa8] sm:$0xff] %vm783_vm3, %v730_v30 }
 0x167   : > { %815 = vst.msk [vmem:[#allocation2 + $0xf8] sm:$0xff] %vm783_vm3, %v750_v42 }
 0x16a   : > { %1075 = vrot.lane.b32.xlu0 %v3785_v45, %s2406_s22  ;;  %1077 = vrot.lane.b32.xlu1 %v3786_v60, %s2406_s22  ;;  %v3809_v45 = vld [vmem:[#allocation28_spill] sm:$0xff]  ;;  %v3810_v60 = vld [vmem:[#allocation29_spill] sm:$0xff] }
 0x16b   : > { %1079 = vrot.lane.b32.xlu2 %v3787_v3, %s2406_s22  ;;  %v3811_v3 = vld [vmem:[#allocation30_spill] sm:$0xff] }
 0x16c   : > { %v734_v61 = vpop.permute.xlu0 %733  ;;  %v736_v55 = vpop.permute.xlu1 %735 }
 0x16d   : > { %807 = vst.msk [vmem:[#allocation2 + $0xb8] sm:$0xff] %vm783_vm3, %v734_v61  ;;  %v885_v63 = vpop.permute.xlu2 %884 }
 0x16e   : > { %808 = vst.msk [vmem:[#allocation2 + $0xc0] sm:$0xff] %vm783_vm3, %v736_v55 }
 0x16f   : > { %979 = vst.msk [vmem:[#allocation2 + $0x10] sm:$0xff] %vm976_vm4, %v885_v63 }
 0x172   : > { %1081 = vrot.lane.b32.xlu0 %v3788_v48, %s2406_s22  ;;  %1083 = vrot.lane.b32.xlu1 %v3789_v57, %s2406_s22  ;;  %v3812_v48 = vld [vmem:[#allocation31_spill] sm:$0xff]  ;;  %v3813_v57 = vld [vmem:[#allocation32_spill] sm:$0xff] }
 0x173   : > { %1085 = vrot.lane.b32.xlu2 %v3790_v52, %s2406_s22 }
 0x174   : > { %v740_v54 = vpop.permute.xlu0 %739  ;;  %v742_v41 = vpop.permute.xlu1 %741 }
 0x175   : > { %810 = vst.msk [vmem:[#allocation2 + $0xd0] sm:$0xff] %vm783_vm3, %v740_v54  ;;  %v891_v56 = vpop.permute.xlu2 %890  ;;  %v3223_v54 = vld [vmem:[%s2444_s17 + $0x182] sm:$0xff] }
 0x176   : > { %811 = vst.msk [vmem:[#allocation2 + $0xd8] sm:$0xff] %vm783_vm3, %v742_v41 }
 0x177   : > { %982 = vst.msk [vmem:[#allocation2 + $0x28] sm:$0xff] %vm976_vm4, %v891_v56  ;;  %v3230_v56 = vld [vmem:[%s2444_s17 + $0x18a] sm:$0xff] }
 0x17a   : > { %1087 = vrot.lane.b32.xlu0 %v3791_v59, %s2406_s22  ;;  %1089 = vrot.lane.b32.xlu1 %v3792_v37, %s2406_s22  ;;  %v2229_v59 = vld [vmem:[%s2444_s17 + $0x30] sm:$0xff] }
 0x17b   : > { %1091 = vrot.lane.b32.xlu2 %v3793_v34, %s2406_s22 }
 0x17c   : > { %v746_v43 = vpop.permute.xlu0 %745  ;;  %v748_v44 = vpop.permute.xlu1 %747 }
 0x17d   : > { %813 = vst.msk [vmem:[#allocation2 + $0xe8] sm:$0xff] %vm783_vm3, %v746_v43  ;;  %v897_v1 = vpop.permute.xlu2 %896  ;;  %v2230_v43 = vld [vmem:[%s2444_s17 + $0x38] sm:$0xff] }
 0x17e   : > { %814 = vst.msk [vmem:[#allocation2 + $0xf0] sm:$0xff] %vm783_vm3, %v748_v44 }
 0x17f   : > { %985 = vst.msk [vmem:[#allocation2 + $0x40] sm:$0xff] %vm976_vm4, %v897_v1 }
 0x182   : > { %1093 = vrot.lane.b32.xlu0 %v3794_v4, %s2406_s22  ;;  %1095 = vrot.lane.b32.xlu1 %v3795_v2, %s2406_s22  ;;  %v2233_v4 = vld [vmem:[%s2444_s17 + $0x60] sm:$0xff] }
 0x183   : > { %1097 = vrot.lane.b32.xlu2 %v3796_v7, %s2406_s22 }
 0x184   : > { %v881_v5 = vpop.permute.xlu0 %880  ;;  %v883_v6 = vpop.permute.xlu1 %882 }
 0x185   : > { %977 = vst.msk [vmem:[#allocation2] sm:$0xff] %vm976_vm4, %v881_v5  ;;  %v903_v8 = vpop.permute.xlu2 %902 }
 0x186   : > { %978 = vst.msk [vmem:[#allocation2 + $0x8] sm:$0xff] %vm976_vm4, %v883_v6 }
 0x187   : > { %988 = vst.msk [vmem:[#allocation2 + $0x58] sm:$0xff] %vm976_vm4, %v903_v8 }
 0x18a   : > { %1099 = vrot.lane.b32.xlu0 %v3797_v9, %s2406_s22  ;;  %1101 = vrot.lane.b32.xlu1 %v3798_v10, %s2406_s22 }
 0x18b   : > { %1103 = vrot.lane.b32.xlu2 %v3799_v13, %s2406_s22 }
 0x18c   : > { %v887_v11 = vpop.permute.xlu0 %886  ;;  %v889_v12 = vpop.permute.xlu1 %888 }
 0x18d   : > { %980 = vst.msk [vmem:[#allocation2 + $0x18] sm:$0xff] %vm976_vm4, %v887_v11  ;;  %v909_v14 = vpop.permute.xlu2 %908 }
 0x18e   : > { %981 = vst.msk [vmem:[#allocation2 + $0x20] sm:$0xff] %vm976_vm4, %v889_v12 }
 0x18f   : > { %991 = vst.msk [vmem:[#allocation2 + $0x70] sm:$0xff] %vm976_vm4, %v909_v14  ;;  %v2277_v14 = vld [vmem:[%s2444_s17 + $0xf1] sm:$0xff] }
 0x192   : > { %1105 = vrot.lane.b32.xlu0 %v3800_v15, %s2406_s22  ;;  %1107 = vrot.lane.b32.xlu1 %v3801_v16, %s2406_s22 }
 0x193   : > { %1109 = vrot.lane.b32.xlu2 %v3802_v19, %s2406_s22 }
 0x194   : > { %v893_v17 = vpop.permute.xlu0 %892  ;;  %v895_v18 = vpop.permute.xlu1 %894 }
 0x195   : > { %983 = vst.msk [vmem:[#allocation2 + $0x30] sm:$0xff] %vm976_vm4, %v893_v17  ;;  %v915_v20 = vpop.permute.xlu2 %914  ;;  %v2309_v17 = vld [vmem:[%s2444_s17 + $0xf2] sm:$0xff] }
 0x196   : > { %984 = vst.msk [vmem:[#allocation2 + $0x38] sm:$0xff] %vm976_vm4, %v895_v18  ;;  %v2317_v18 = vld [vmem:[%s2444_s17 + $0x152] sm:$0xff] }
 0x197   : > { %994 = vst.msk [vmem:[#allocation2 + $0x88] sm:$0xff] %vm976_vm4, %v915_v20 }
 0x19a   : > { %1111 = vrot.lane.b32.xlu0 %v3803_v21, %s2406_s22  ;;  %1113 = vrot.lane.b32.xlu1 %v3804_v22, %s2406_s22  ;;  %v2269_v22 = vld [vmem:[%s2444_s17 + $0x91] sm:$0xff] }
 0x19b   : > { %1115 = vrot.lane.b32.xlu2 %v3805_v25, %s2406_s22 }
 0x19c   : > { %v899_v23 = vpop.permute.xlu0 %898  ;;  %v901_v24 = vpop.permute.xlu1 %900 }
 0x19d   : > { %986 = vst.msk [vmem:[#allocation2 + $0x48] sm:$0xff] %vm976_vm4, %v899_v23  ;;  %v921_v26 = vpop.permute.xlu2 %920  ;;  %v2246_v23 = vld [vmem:[%s2444_s17 + $0xf8] sm:$0xff] }
 0x19e   : > { %987 = vst.msk [vmem:[#allocation2 + $0x50] sm:$0xff] %vm976_vm4, %v901_v24 }
 0x19f   : > { %997 = vst.msk [vmem:[#allocation2 + $0xa0] sm:$0xff] %vm976_vm4, %v921_v26 }
 0x1a2   : > { %1117 = vrot.lane.b32.xlu0 %v3806_v27, %s2406_s22  ;;  %1119 = vrot.lane.b32.xlu1 %v3807_v38, %s2406_s22  ;;  %v2293_v27 = vld [vmem:[%s2444_s17 + $0x32] sm:$0xff] }
 0x1a3   : > { %1121 = vrot.lane.b32.xlu2 %v3808_v31, %s2406_s22  ;;  %v2301_v38 = vld [vmem:[%s2444_s17 + $0x92] sm:$0xff] }
 0x1a4   : > { %v905_v29 = vpop.permute.xlu0 %904  ;;  %v907_v30 = vpop.permute.xlu1 %906 }
 0x1a5   : > { %989 = vst.msk [vmem:[#allocation2 + $0x60] sm:$0xff] %vm976_vm4, %v905_v29  ;;  %v927_v42 = vpop.permute.xlu2 %926 }
 0x1a6   : > { %990 = vst.msk [vmem:[#allocation2 + $0x68] sm:$0xff] %vm976_vm4, %v907_v30  ;;  %v2278_v30 = vld [vmem:[%s2444_s17 + $0xf9] sm:$0xff] }
 0x1a7   : > { %1000 = vst.msk [vmem:[#allocation2 + $0xb8] sm:$0xff] %vm976_vm4, %v927_v42 }
 0x1aa   : > { %1123 = vrot.lane.b32.xlu0 %v3809_v45, %s2406_s22  ;;  %1125 = vrot.lane.b32.xlu1 %v3810_v60, %s2406_s22  ;;  %v2310_v45 = vld [vmem:[%s2444_s17 + $0xfa] sm:$0xff] }
 0x1ab   : > { %1127 = vrot.lane.b32.xlu2 %v3811_v3, %s2406_s22 }
 0x1ac   : > { %v911_v61 = vpop.permute.xlu0 %910  ;;  %v913_v55 = vpop.permute.xlu1 %912 }
 0x1ad   : > { %992 = vst.msk [vmem:[#allocation2 + $0x78] sm:$0xff] %vm976_vm4, %v911_v61  ;;  %v933_v63 = vpop.permute.xlu2 %932  ;;  %v2318_v61 = vld [vmem:[%s2444_s17 + $0x15a] sm:$0xff] }
 0x1ae   : > { %993 = vst.msk [vmem:[#allocation2 + $0x80] sm:$0xff] %vm976_vm4, %v913_v55 }
 0x1af   : > { %1003 = vst.msk [vmem:[#allocation2 + $0xd0] sm:$0xff] %vm976_vm4, %v933_v63  ;;  %v2262_v63 = vld [vmem:[%s2444_s17 + $0x39] sm:$0xff] }
 0x1b2   : > { %1129 = vrot.lane.b32.xlu0 %v3812_v48, %s2406_s22  ;;  %1131 = vrot.lane.b32.xlu1 %v3813_v57, %s2406_s22  ;;  %v2270_v48 = vld [vmem:[%s2444_s17 + $0x99] sm:$0xff] }
 0x1b3   : > { %1133 = vrot.lane.b32.xlu2 %v3223_v54, %s2406_s22 }
 0x1b4   : > { %v917_v41 = vpop.permute.xlu0 %916  ;;  %v919_v52 = vpop.permute.xlu1 %918 }
 0x1b5   : > { %995 = vst.msk [vmem:[#allocation2 + $0x90] sm:$0xff] %vm976_vm4, %v917_v41  ;;  %v939_v37 = vpop.permute.xlu2 %938  ;;  %v2247_v41 = vld [vmem:[%s2444_s17 + $0x108] sm:$0xff] }
 0x1b6   : > { %996 = vst.msk [vmem:[#allocation2 + $0x98] sm:$0xff] %vm976_vm4, %v919_v52 }
 0x1b7   : > { %1006 = vst.msk [vmem:[#allocation2 + $0xe8] sm:$0xff] %vm976_vm4, %v939_v37  ;;  %v2294_v37 = vld [vmem:[%s2444_s17 + $0x3a] sm:$0xff] }
 0x1ba   : > { %1135 = vrot.lane.b32.xlu0 %v3230_v56, %s2406_s22  ;;  %1267 = vrot.lane.b32.xlu1 %v2229_v59, %s2407_s23 }
 0x1bb   : > { %1269 = vrot.lane.b32.xlu2 %v2230_v43, %s2407_s23 }
 0x1bc   : > { %v923_v44 = vpop.permute.xlu0 %922  ;;  %v925_v34 = vpop.permute.xlu1 %924 }
 0x1bd   : > { %998 = vst.msk [vmem:[#allocation2 + $0xa8] sm:$0xff] %vm976_vm4, %v923_v44  ;;  %v1074_v1 = vpop.permute.xlu2 %1073  ;;  %v2302_v44 = vld [vmem:[%s2444_s17 + $0x9a] sm:$0xff] }
 0x1be   : > { %999 = vst.msk [vmem:[#allocation2 + $0xb0] sm:$0xff] %vm976_vm4, %v925_v34 }
 0x1bf   : > { %1170 = vst.msk [vmem:[#allocation2] sm:$0xff] %vm1169_vm5, %v1074_v1 }
 0x1c2   : > { %1271 = vrot.lane.b32.xlu0 %v2651_v46, %s2407_s23  ;;  %1273 = vrot.lane.b32.xlu1 %v2674_v51, %s2407_s23  ;;  %v2236_v46 = vld [vmem:[%s2444_s17 + $0x80] sm:$0xff] }
 0x1c3   : > { %1275 = vrot.lane.b32.xlu2 %v2233_v4, %s2407_s23  ;;  %v2279_v4 = vld [vmem:[%s2444_s17 + $0x109] sm:$0xff] }
 0x1c4   : > { %v929_v2 = vpop.permute.xlu0 %928  ;;  %v931_v5 = vpop.permute.xlu1 %930 }
 0x1c5   : > { %1001 = vst.msk [vmem:[#allocation2 + $0xc0] sm:$0xff] %vm976_vm4, %v929_v2  ;;  %v1080_v6 = vpop.permute.xlu2 %1079  ;;  %v2287_v2 = vld [vmem:[%s2444_s17 + $0x169] sm:$0xff] }
 0x1c6   : > { %1002 = vst.msk [vmem:[#allocation2 + $0xc8] sm:$0xff] %vm976_vm4, %v931_v5 }
 0x1c7   : > { %1173 = vst.msk [vmem:[#allocation2 + $0x18] sm:$0xff] %vm1169_vm5, %v1080_v6 }
 0x1ca   : > { %1277 = vrot.lane.b32.xlu0 %v2682_v53, %s2407_s23  ;;  %1279 = vrot.lane.b32.xlu1 %v2705_v58, %s2407_s23  ;;  %v2239_v53 = vld [vmem:[%s2444_s17 + $0xa8] sm:$0xff] }
 0x1cb   : > { %1281 = vrot.lane.b32.xlu2 %v2236_v46, %s2407_s23 }
 0x1cc   : > { %v935_v51 = vpop.permute.xlu0 %934  ;;  %v937_v7 = vpop.permute.xlu1 %936 }
 0x1cd   : > { %1004 = vst.msk [vmem:[#allocation2 + $0xd8] sm:$0xff] %vm976_vm4, %v935_v51  ;;  %v1086_v8 = vpop.permute.xlu2 %1085  ;;  %v2319_v51 = vld [vmem:[%s2444_s17 + $0x16a] sm:$0xff] }
 0x1ce   : > { %1005 = vst.msk [vmem:[#allocation2 + $0xe0] sm:$0xff] %vm976_vm4, %v937_v7  ;;  %v2263_v7 = vld [vmem:[%s2444_s17 + $0x49] sm:$0xff] }
 0x1cf   : > { %1176 = vst.msk [vmem:[#allocation2 + $0x30] sm:$0xff] %vm1169_vm5, %v1086_v8 }
 0x1d2   : > { %1283 = vrot.lane.b32.xlu0 %v2715_v62, %s2407_s23  ;;  %1285 = vrot.lane.b32.xlu1 %v2738_v33, %s2407_s23  ;;  %v2242_v62 = vld [vmem:[%s2444_s17 + $0xc8] sm:$0xff] }
 0x1d3   : > { %1287 = vrot.lane.b32.xlu2 %v2239_v53, %s2407_s23  ;;  %v2271_v53 = vld [vmem:[%s2444_s17 + $0xa9] sm:$0xff] }
 0x1d4   : > { %v941_v58 = vpop.permute.xlu0 %940  ;;  %v943_v9 = vpop.permute.xlu1 %942 }
 0x1d5   : > { %1007 = vst.msk [vmem:[#allocation2 + $0xf0] sm:$0xff] %vm976_vm4, %v941_v58  ;;  %v1092_v10 = vpop.permute.xlu2 %1091 }
 0x1d6   : > { %1008 = vst.msk [vmem:[#allocation2 + $0xf8] sm:$0xff] %vm976_vm4, %v943_v9 }
 0x1d7   : > { %1179 = vst.msk [vmem:[#allocation2 + $0x48] sm:$0xff] %vm1169_vm5, %v1092_v10  ;;  %v2248_v10 = vld [vmem:[%s2444_s17 + $0x110] sm:$0xff] }
 0x1da   : > { %1289 = vrot.lane.b32.xlu0 %v2748_v49, %s2407_s23  ;;  %1291 = vrot.lane.b32.xlu1 %v2771_v39, %s2407_s23  ;;  %v2245_v49 = vld [vmem:[%s2444_s17 + $0xf0] sm:$0xff] }
 0x1db   : > { %1293 = vrot.lane.b32.xlu2 %v2242_v62, %s2407_s23  ;;  %v2256_v62 = vld [vmem:[%s2444_s17 + $0x170] sm:$0xff] }
 0x1dc   : > { %v1076_v33 = vpop.permute.xlu0 %1075  ;;  %v1078_v11 = vpop.permute.xlu1 %1077 }
 0x1dd   : > { %1171 = vst.msk [vmem:[#allocation2 + $0x8] sm:$0xff] %vm1169_vm5, %v1076_v33  ;;  %v1098_v12 = vpop.permute.xlu2 %1097 }
 0x1de   : > { %1172 = vst.msk [vmem:[#allocation2 + $0x10] sm:$0xff] %vm1169_vm5, %v1078_v11  ;;  %v2295_v11 = vld [vmem:[%s2444_s17 + $0x4a] sm:$0xff] }
 0x1df   : > { %1182 = vst.msk [vmem:[#allocation2 + $0x60] sm:$0xff] %vm1169_vm5, %v1098_v12 }
 0x1e2   : > { %1295 = vrot.lane.b32.xlu0 %v2781_v0, %s2407_s23  ;;  %1297 = vrot.lane.b32.xlu1 %v2804_v32, %s2407_s23  ;;  %v2285_v0 = vld [vmem:[%s2444_s17 + $0x151] sm:$0xff] }
 0x1e3   : > { %1299 = vrot.lane.b32.xlu2 %v2245_v49, %s2407_s23 }
 0x1e4   : > { %v1082_v39 = vpop.permute.xlu0 %1081  ;;  %v1084_v13 = vpop.permute.xlu1 %1083 }
 0x1e5   : > { %1174 = vst.msk [vmem:[#allocation2 + $0x20] sm:$0xff] %vm1169_vm5, %v1082_v39  ;;  %v1104_v15 = vpop.permute.xlu2 %1103  ;;  %v2303_v39 = vld [vmem:[%s2444_s17 + $0xaa] sm:$0xff] }
 0x1e6   : > { %1175 = vst.msk [vmem:[#allocation2 + $0x28] sm:$0xff] %vm1169_vm5, %v1084_v13  ;;  %v2280_v13 = vld [vmem:[%s2444_s17 + $0x111] sm:$0xff] }
 0x1e7   : > { %1185 = vst.msk [vmem:[#allocation2 + $0x78] sm:$0xff] %vm1169_vm5, %v1104_v15  ;;  %v2288_v15 = vld [vmem:[%s2444_s17 + $0x171] sm:$0xff] }
 0x1ea   : > { %1315 = vrot.lane.b32.xlu0 %v2903_v50, %s2407_s23  ;;  %1492 = vrot.lane.b32.xlu1 %v2277_v14, %s2408_s24  ;;  %v2261_v50 = vld [vmem:[%s2444_s17 + $0x31] sm:$0xff] }
 0x1eb   : > { %1508 = vrot.lane.b32.xlu2 %v2285_v0, %s2408_s24 }
 0x1ec   : > { %v1088_v32 = vpop.permute.xlu0 %1087  ;;  %v1090_v16 = vpop.permute.xlu1 %1089 }
 0x1ed   : > { %1177 = vst.msk [vmem:[#allocation2 + $0x38] sm:$0xff] %vm1169_vm5, %v1088_v32  ;;  %v1110_v19 = vpop.permute.xlu2 %1109 }
 0x1ee   : > { %1178 = vst.msk [vmem:[#allocation2 + $0x40] sm:$0xff] %vm1169_vm5, %v1090_v16  ;;  %v2312_v16 = vld [vmem:[%s2444_s17 + $0x112] sm:$0xff] }
 0x1ef   : > { %1188 = vst.msk [vmem:[#allocation2 + $0x90] sm:$0xff] %vm1169_vm5, %v1110_v19  ;;  %v2264_v19 = vld [vmem:[%s2444_s17 + $0x51] sm:$0xff] }
 0x1f2   : > { %1685 = vrot.lane.b32.xlu0 %v2309_v17, %s2409_s25  ;;  %1701 = vrot.lane.b32.xlu1 %v2317_v18, %s2409_s25  ;;  %v2320_v17 = vld [vmem:[%s2444_s17 + $0x172] sm:$0xff] }
 0x1f3   : > { %1460 = vrot.lane.b32.xlu2 %v2261_v50, %s2408_s24  ;;  %v1818_v50 = vld [vmem:[%s3721_s1 + $0x20] sm:$0xf] }
 0x1f4   : > { %v1094_v20 = vpop.permute.xlu0 %1093  ;;  %v1096_v21 = vpop.permute.xlu1 %1095  ;;  %2362 = vmatpush.msk.msra.mxu2 %vm1920_vm7, %v1818_v50  ;;  %2363 = vmatpush.msk.msra.mxu3 %vm1920_vm7, %v1818_v50 }
 0x1f5   : > { %1180 = vst.msk [vmem:[#allocation2 + $0x50] sm:$0xff] %vm1169_vm5, %v1094_v20  ;;  %v1116_v24 = vpop.permute.xlu2 %1115  ;;  %2325 = vmatpush.msk.msra.mxu0 %vm1920_vm7, %v1818_v50  ;;  %2361 = vmatpush.msk.msra.mxu1 %vm1920_vm7, %v1818_v50  ;;  %v2323_v50 = vld [vmem:[%s2444_s17 + $0x19a] sm:$0xff] }
 0x1f6   : > { %1181 = vst.msk [vmem:[#allocation2 + $0x58] sm:$0xff] %vm1169_vm5, %v1096_v21 }
 0x1f7   : > { %1191 = vst.msk [vmem:[#allocation2 + $0xa8] sm:$0xff] %vm1169_vm5, %v1116_v24  ;;  %v2272_v24 = vld [vmem:[%s2444_s17 + $0xb1] sm:$0xff] }
 0x1fa   : > { %1476 = vrot.lane.b32.xlu0 %v2269_v22, %s2408_s24  ;;  %1301 = vrot.lane.b32.xlu1 %v2246_v23, %s2407_s23  ;;  %v1817_v22 = vld [vmem:[%s3721_s1 + $0x18] sm:$0xff]  ;;  %v1816_v23 = vld [vmem:[%s3721_s1 + $0x10] sm:$0xff] }
 0x1fb   : > { %1317 = vrot.lane.b32.xlu2 %v2906_v47, %s2407_s23  ;;  %v2286_v47 = vld [vmem:[%s2444_s17 + $0x159] sm:$0xff]  ;;  %2365 = vmatpush.msra.mxu2 %v1817_v22 }
 0x1fc   : > { %v1100_v25 = vpop.permute.xlu0 %1099  ;;  %v1102_v26 = vpop.permute.xlu1 %1101  ;;  %2366 = vmatpush.msra.mxu3 %v1817_v22  ;;  %1936 = vmatpush.msra.mxu0 %v1817_v22 }
 0x1fd   : > { %1183 = vst.msk [vmem:[#allocation2 + $0x68] sm:$0xff] %vm1169_vm5, %v1100_v25  ;;  %v1122_v29 = vpop.permute.xlu2 %1121  ;;  %v2249_v25 = vld [vmem:[%s2444_s17 + $0x120] sm:$0xff]  ;;  %2364 = vmatpush.msra.mxu1 %v1817_v22  ;;  %2368 = vmatpush.msra.mxu2 %v1816_v23 }
 0x1fe   : > { %1184 = vst.msk [vmem:[#allocation2 + $0x70] sm:$0xff] %vm1169_vm5, %v1102_v26  ;;  %2369 = vmatpush.msra.mxu3 %v1816_v23  ;;  %1937 = vmatpush.msra.mxu0 %v1816_v23 }
 0x1ff   : > { %1194 = vst.msk [vmem:[#allocation2 + $0xc0] sm:$0xff] %vm1169_vm5, %v1122_v29  ;;  %2367 = vmatpush.msra.mxu1 %v1816_v23  ;;  %v1814_v29 = vld [vmem:[%s3721_s1] sm:$0xff] }
 0x202   : > { %1653 = vrot.lane.b32.xlu0 %v2293_v27, %s2409_s25  ;;  %1669 = vrot.lane.b32.xlu1 %v2301_v38, %s2409_s25  ;;  %v1815_v27 = vld [vmem:[%s3721_s1 + $0x8] sm:$0xff]  ;;  %v2257_v38 = vld [vmem:[%s2444_s17 + $0x180] sm:$0xff] }
 0x203   : > { %1494 = vrot.lane.b32.xlu2 %v2278_v30, %s2408_s24  ;;  %2371 = vmatpush.msra.mxu2 %v1815_v27 }
 0x204   : > { %v1106_v31 = vpop.permute.xlu0 %1105  ;;  %v1108_v42 = vpop.permute.xlu1 %1107  ;;  %2372 = vmatpush.msra.mxu3 %v1815_v27  ;;  %1938 = vmatpush.msra.mxu0 %v1815_v27 }
 0x205   : > { %1186 = vst.msk [vmem:[#allocation2 + $0x80] sm:$0xff] %vm1169_vm5, %v1106_v31  ;;  %v1128_v60 = vpop.permute.xlu2 %1127  ;;  %2370 = vmatpush.msra.mxu1 %v1815_v27  ;;  %2374 = vmatpush.msra.mxu2 %v1814_v29 }
 0x206   : > { %1187 = vst.msk [vmem:[#allocation2 + $0x88] sm:$0xff] %vm1169_vm5, %v1108_v42  ;;  %2375 = vmatpush.msra.mxu3 %v1814_v29  ;;  %1939 = vmatpush.msra.mxu0 %v1814_v29  ;;  %v2296_v42 = vld [vmem:[%s2444_s17 + $0x52] sm:$0xff] }
 0x207   : > { %1197 = vst.msk [vmem:[#allocation2 + $0xd8] sm:$0xff] %vm1169_vm5, %v1128_v60  ;;  %2373 = vmatpush.msra.mxu1 %v1814_v29  ;;  %v2281_v60 = vld [vmem:[%s2444_s17 + $0x121] sm:$0xff] }
 0x20a   : > { %1510 = vrot.lane.b32.xlu0 %v2286_v47, %s2408_s24  ;;  %1687 = vrot.lane.b32.xlu1 %v2310_v45, %s2409_s25  ;;  %v2304_v47 = vld [vmem:[%s2444_s17 + $0xb2] sm:$0xff] }
 0x20b   : > { %1703 = vrot.lane.b32.xlu2 %v2318_v61, %s2409_s25 }
 0x20c   : > { %v1112_v55 = vpop.permute.xlu0 %1111  ;;  %v1114_v3 = vpop.permute.xlu1 %1113 }
 0x20d   : > { %1189 = vst.msk [vmem:[#allocation2 + $0x98] sm:$0xff] %vm1169_vm5, %v1112_v55  ;;  %v1134_v57 = vpop.permute.xlu2 %1133 }
 0x20e   : > { %1190 = vst.msk [vmem:[#allocation2 + $0xa0] sm:$0xff] %vm1169_vm5, %v1114_v3  ;;  %v2313_v3 = vld [vmem:[%s2444_s17 + $0x122] sm:$0xff] }
 0x20f   : > { %1200 = vst.msk [vmem:[#allocation2 + $0xf0] sm:$0xff] %vm1169_vm5, %v1134_v57 }
 0x212   : > { %1462 = vrot.lane.b32.xlu0 %v2262_v63, %s2408_s24  ;;  %1478 = vrot.lane.b32.xlu1 %v2270_v48, %s2408_s24 }
 0x213   : > { %1303 = vrot.lane.b32.xlu2 %v2247_v41, %s2407_s23  ;;  %v2265_v41 = vld [vmem:[%s2444_s17 + $0x61] sm:$0xff] }
 0x214   : > { %v1118_v52 = vpop.permute.xlu0 %1117  ;;  %v1120_v59 = vpop.permute.xlu1 %1119 }
 0x215   : > { %1192 = vst.msk [vmem:[#allocation2 + $0xb0] sm:$0xff] %vm1169_vm5, %v1118_v52  ;;  %v1270_v43 = vpop.permute.xlu2 %1269  ;;  %v2273_v52 = vld [vmem:[%s2444_s17 + $0xc1] sm:$0xff] }
 0x216   : > { %1193 = vst.msk [vmem:[#allocation2 + $0xb8] sm:$0xff] %vm1169_vm5, %v1120_v59 }
 0x217   : > { %1365 = vst.msk [vmem:[#allocation2 + $0x8] sm:$0xff] %vm1363_vm6, %v1270_v43 }
 0x21a   : > { %1319 = vrot.lane.b32.xlu0 %v2913_v40, %s2407_s23  ;;  %1655 = vrot.lane.b32.xlu1 %v2294_v37, %s2409_s25  ;;  %v2311_v40 = vld [vmem:[%s2444_s17 + $0x10a] sm:$0xff] }
 0x21b   : > { %1671 = vrot.lane.b32.xlu2 %v2302_v44, %s2409_s25 }
 0x21c   : > { %v1124_v34 = vpop.permute.xlu0 %1123  ;;  %v1126_v1 = vpop.permute.xlu1 %1125 }
 0x21d   : > { %1195 = vst.msk [vmem:[#allocation2 + $0xc8] sm:$0xff] %vm1169_vm5, %v1124_v34  ;;  %v1276_v5 = vpop.permute.xlu2 %1275  ;;  %v2305_v34 = vld [vmem:[%s2444_s17 + $0xc2] sm:$0xff] }
 0x21e   : > { %1196 = vst.msk [vmem:[#allocation2 + $0xd0] sm:$0xff] %vm1169_vm5, %v1126_v1 }
 0x21f   : > { %1368 = vst.msk [vmem:[#allocation2 + $0x20] sm:$0xff] %vm1363_vm6, %v1276_v5 }
 0x222   : > { %1496 = vrot.lane.b32.xlu0 %v2279_v4, %s2408_s24  ;;  %1512 = vrot.lane.b32.xlu1 %v2287_v2, %s2408_s24 }
 0x223   : > { %1689 = vrot.lane.b32.xlu2 %v2311_v40, %s2409_s25 }
 0x224   : > { %v1130_v6 = vpop.permute.xlu0 %1129  ;;  %v1132_v46 = vpop.permute.xlu1 %1131 }
 0x225   : > { %1198 = vst.msk [vmem:[#allocation2 + $0xe0] sm:$0xff] %vm1169_vm5, %v1130_v6  ;;  %v1282_v8 = vpop.permute.xlu2 %1281  ;;  %v2314_v6 = vld [vmem:[%s2444_s17 + $0x12a] sm:$0xff] }
 0x226   : > { %1199 = vst.msk [vmem:[#allocation2 + $0xe8] sm:$0xff] %vm1169_vm5, %v1132_v46 }
 0x227   : > { %1371 = vst.msk [vmem:[#allocation2 + $0x38] sm:$0xff] %vm1363_vm6, %v1282_v8 }
 0x22a   : > { %1705 = vrot.lane.b32.xlu0 %v2319_v51, %s2409_s25  ;;  %1464 = vrot.lane.b32.xlu1 %v2263_v7, %s2408_s24  ;;  %v2266_v7 = vld [vmem:[%s2444_s17 + $0x69] sm:$0xff] }
 0x22b   : > { %1480 = vrot.lane.b32.xlu2 %v2271_v53, %s2408_s24  ;;  %v2274_v53 = vld [vmem:[%s2444_s17 + $0xc9] sm:$0xff] }
 0x22c   : > { %v1136_v58 = vpop.permute.xlu0 %1135  ;;  %v1268_v9 = vpop.permute.xlu1 %1267 }
 0x22d   : > { %1201 = vst.msk [vmem:[#allocation2 + $0xf8] sm:$0xff] %vm1169_vm5, %v1136_v58  ;;  %v1288_v33 = vpop.permute.xlu2 %1287 }
 0x22e   : > { %1364 = vst.msk [vmem:[#allocation2] sm:$0xff] %vm1363_vm6, %v1268_v9 }
 0x22f   : > { %1374 = vst.msk [vmem:[#allocation2 + $0x50] sm:$0xff] %vm1363_vm6, %v1288_v33 }
 0x232   : > { %1305 = vrot.lane.b32.xlu0 %v2248_v10, %s2407_s23  ;;  %1321 = vrot.lane.b32.xlu1 %v2256_v62, %s2407_s23  ;;  %v2259_v62 = vld [vmem:[%s2444_s17 + $0x198] sm:$0xff] }
 0x233   : > { %1657 = vrot.lane.b32.xlu2 %v2295_v11, %s2409_s25  ;;  %v2298_v11 = vld [vmem:[%s2444_s17 + $0x6a] sm:$0xff] }
 0x234   : > { %v1272_v12 = vpop.permute.xlu0 %1271  ;;  %v1274_v49 = vpop.permute.xlu1 %1273 }
 0x235   : > { %1366 = vst.msk [vmem:[#allocation2 + $0x10] sm:$0xff] %vm1363_vm6, %v1272_v12  ;;  %v1294_v14 = vpop.permute.xlu2 %1293 }
 0x236   : > { %1367 = vst.msk [vmem:[#allocation2 + $0x18] sm:$0xff] %vm1363_vm6, %v1274_v49 }
 0x237   : > { %1377 = vst.msk [vmem:[#allocation2 + $0x68] sm:$0xff] %vm1363_vm6, %v1294_v14  ;;  %v2306_v14 = vld [vmem:[%s2444_s17 + $0xca] sm:$0xff] }
 0x23a   : > { %1673 = vrot.lane.b32.xlu0 %v2303_v39, %s2409_s25  ;;  %1498 = vrot.lane.b32.xlu1 %v2280_v13, %s2408_s24 }
 0x23b   : > { %1514 = vrot.lane.b32.xlu2 %v2288_v15, %s2408_s24  ;;  %v2283_v15 = vld [vmem:[%s2444_s17 + $0x139] sm:$0xff] }
 0x23c   : > { %v1278_v0 = vpop.permute.xlu0 %1277  ;;  %v1280_v32 = vpop.permute.xlu1 %1279 }
 0x23d   : > { %1369 = vst.msk [vmem:[#allocation2 + $0x28] sm:$0xff] %vm1363_vm6, %v1278_v0  ;;  %v1300_v18 = vpop.permute.xlu2 %1299 }
 0x23e   : > { %1370 = vst.msk [vmem:[#allocation2 + $0x30] sm:$0xff] %vm1363_vm6, %v1280_v32  ;;  %v2291_v32 = vld [vmem:[%s2444_s17 + $0x199] sm:$0xff] }
 0x23f   : > { %1380 = vst.msk [vmem:[#allocation2 + $0x80] sm:$0xff] %vm1363_vm6, %v1300_v18 }
 0x242   : > { %1691 = vrot.lane.b32.xlu0 %v2312_v16, %s2409_s25  ;;  %1707 = vrot.lane.b32.xlu1 %v2320_v17, %s2409_s25 }
 0x243   : > { %1466 = vrot.lane.b32.xlu2 %v2264_v19, %s2408_s24  ;;  %v2315_v19 = vld [vmem:[%s2444_s17 + $0x13a] sm:$0xff] }
 0x244   : > { %v1284_v20 = vpop.permute.xlu0 %1283  ;;  %v1286_v21 = vpop.permute.xlu1 %1285 }
 0x245   : > { %1372 = vst.msk [vmem:[#allocation2 + $0x40] sm:$0xff] %vm1363_vm6, %v1284_v20  ;;  %v1509_v26 = vpop.permute.xlu2 %1508 }
 0x246   : > { %1373 = vst.msk [vmem:[#allocation2 + $0x48] sm:$0xff] %vm1363_vm6, %v1286_v21  ;;  %v2267_v21 = vld [vmem:[%s2444_s17 + $0x79] sm:$0xff] }
 0x24a   : > { %1482 = vrot.lane.b32.xlu0 %v2272_v24, %s2408_s24  ;;  %1307 = vrot.lane.b32.xlu1 %v2249_v25, %s2407_s23  ;;  %v2275_v25 = vld [vmem:[%s2444_s17 + $0xd9] sm:$0xff] }
 0x24b   : > { %1323 = vrot.lane.b32.xlu2 %v2257_v38, %s2407_s23  ;;  %v2260_v38 = vld [vmem:[%s2444_s17 + $0x1a0] sm:$0xff] }
 0x24c   : > { %v1290_v30 = vpop.permute.xlu0 %1289  ;;  %v1292_v31 = vpop.permute.xlu1 %1291 }
 0x24d   : > { %1375 = vst.msk [vmem:[#allocation2 + $0x58] sm:$0xff] %vm1363_vm6, %v1290_v30  ;;  %v1461_v45 = vpop.permute.xlu2 %1460 }
 0x24e   : > { %1376 = vst.msk [vmem:[#allocation2 + $0x60] sm:$0xff] %vm1363_vm6, %v1292_v31 }
 0x24f   : > { %1557 = vst.msk [vmem:[#allocation2] sm:$0xff] %vm1556_vm8, %v1461_v45 }
 0x252   : > { %1659 = vrot.lane.b32.xlu0 %v2296_v42, %s2409_s25  ;;  %1675 = vrot.lane.b32.xlu1 %v2304_v47, %s2409_s25  ;;  %v2299_v42 = vld [vmem:[%s2444_s17 + $0x7a] sm:$0xff] }
 0x253   : > { %1500 = vrot.lane.b32.xlu2 %v2281_v60, %s2408_s24  ;;  %v2307_v47 = vld [vmem:[%s2444_s17 + $0xda] sm:$0xff] }
 0x254   : > { %v1296_v61 = vpop.permute.xlu0 %1295  ;;  %v1298_v55 = vpop.permute.xlu1 %1297  ;;  %v2284_v60 = vld [vmem:[%s2444_s17 + $0x141] sm:$0xff] }
 0x255   : > { %1378 = vst.msk [vmem:[#allocation2 + $0x70] sm:$0xff] %vm1363_vm6, %v1296_v61  ;;  %v1318_v63 = vpop.permute.xlu2 %1317 }
 0x256   : > { %1379 = vst.msk [vmem:[#allocation2 + $0x78] sm:$0xff] %vm1363_vm6, %v1298_v55 }
 0x257   : > { %1389 = vst.msk [vmem:[#allocation2 + $0xc8] sm:$0xff] %vm1363_vm6, %v1318_v63 }
 0x25a   : > { %1516 = vrot.lane.b32.xlu0 %v3122_v28, %s2408_s24  ;;  %1693 = vrot.lane.b32.xlu1 %v2313_v3, %s2409_s25  ;;  %v2250_v28 = vld [vmem:[%s2444_s17 + $0x128] sm:$0xff] }
 0x25b   : > { %1709 = vrot.lane.b32.xlu2 %v3223_v54, %s2409_s25  ;;  %v2297_v54 = vld [vmem:[%s2444_s17 + $0x62] sm:$0xff] }
 0x25c   : > { %v1316_v48 = vpop.permute.xlu0 %1315  ;;  %v1493_v57 = vpop.permute.xlu1 %1492 }
 0x25d   : > { %1388 = vst.msk [vmem:[#allocation2 + $0xc0] sm:$0xff] %vm1363_vm6, %v1316_v48  ;;  %v1495_v59 = vpop.permute.xlu2 %1494  ;;  %v2292_v48 = vld [vmem:[%s2444_s17 + $0x1a1] sm:$0xff] }
 0x25e   : > { %1573 = vst.msk [vmem:[#allocation2 + $0x80] sm:$0xff] %vm1556_vm8, %v1493_v57  ;;  %v2316_v57 = vld [vmem:[%s2444_s17 + $0x142] sm:$0xff] }
 0x25f   : > { %1581 = vst.msk [vmem:[#allocation2 + $0xc0] sm:$0xff] %vm1556_vm8, %v1509_v26  ;;  %v2252_v26 = vld [vmem:[%s2444_s17 + $0x140] sm:$0xff] }
 0x262   : > { %1468 = vrot.lane.b32.xlu0 %v2265_v41, %s2408_s24  ;;  %1484 = vrot.lane.b32.xlu1 %v2273_v52, %s2408_s24  ;;  %v2324_v52 = vld [vmem:[%s2444_s17 + $0x1a2] sm:$0xff] }
 0x263   : > { %1309 = vrot.lane.b32.xlu2 %v2250_v28, %s2407_s23 }
 0x264   : > { %v1686_v37 = vpop.permute.xlu0 %1685  ;;  %v1702_v43 = vpop.permute.xlu1 %1701 }
 0x265   : > { %1766 = vst.msk [vmem:[#allocation2 + $0x80] sm:$0xff] %vm1749_vm9, %v1686_v37  ;;  %v1704_v44 = vpop.permute.xlu2 %1703  ;;  %v2268_v37 = vld [vmem:[%s2444_s17 + $0x81] sm:$0xff] }
 0x266   : > { %1774 = vst.msk [vmem:[#allocation2 + $0xc0] sm:$0xff] %vm1749_vm9, %v1702_v43  ;;  %v2276_v43 = vld [vmem:[%s2444_s17 + $0xe1] sm:$0xff] }
 0x26a   : > { %1325 = vrot.lane.b32.xlu0 %v3025_v35, %s2407_s23  ;;  %1661 = vrot.lane.b32.xlu1 %v2297_v54, %s2409_s25  ;;  %v2282_v35 = vld [vmem:[%s2444_s17 + $0x129] sm:$0xff] }
 0x26b   : > { %1677 = vrot.lane.b32.xlu2 %v2305_v34, %s2409_s25 }
 0x26c   : > { %v1477_v1 = vpop.permute.xlu0 %1476  ;;  %v1798_v4 = vld [vmem:[#allocation2 + $0x80] sm:$0xff]  ;;  %v1302_v2 = vpop.permute.xlu1 %1301 }
 0x26d   : > { %1565 = vst.msk [vmem:[#allocation2 + $0x40] sm:$0xff] %vm1556_vm8, %v1477_v1  ;;  %2342 = vmatmul.msk.f32.vlgmr.msra.gmra.mxu2 %vm1823_vm10, %v1798_v4  ;;  %v1806_v5 = vld [vmem:[#allocation2 + $0xc0] sm:$0xff]  ;;  %v1304_v40 = vpop.permute.xlu2 %1303 }
 0x26e   : > { %1381 = vst.msk [vmem:[#allocation2 + $0x88] sm:$0xff] %vm1363_vm6, %v1302_v2  ;;  %2350 = vmatmul.msk.f32.vlgmr.msra.gmra.mxu3 %vm1823_vm10, %v1806_v5  ;;  %v2308_v2 = vld [vmem:[%s2444_s17 + $0xe2] sm:$0xff] }
 0x26f   : > { %1574 = vst.msk [vmem:[#allocation2 + $0x88] sm:$0xff] %vm1556_vm8, %v1495_v59 }
 0x270   : > { %1382 = vst.msk [vmem:[#allocation2 + $0x90] sm:$0xff] %vm1363_vm6, %v1304_v40 }
 0x272   : > { %1502 = vrot.lane.b32.xlu0 %v2282_v35, %s2408_s24  ;;  %1518 = vrot.lane.b32.xlu1 %v3125_v36, %s2408_s24 }
 0x273   : > { %1695 = vrot.lane.b32.xlu2 %v2314_v6, %s2409_s25 }
 0x274   : > { %v1654_v46 = vpop.permute.xlu0 %1653  ;;  %v1670_v51 = vpop.permute.xlu1 %1669 }
 0x275   : > { %1750 = vst.msk [vmem:[#allocation2] sm:$0xff] %vm1749_vm9, %v1654_v46  ;;  %v1672_v8 = vpop.permute.xlu2 %1671 }
 0x276   : > { %1758 = vst.msk [vmem:[#allocation2 + $0x40] sm:$0xff] %vm1749_vm9, %v1670_v51 }
 0x27a   : > { %1711 = vrot.lane.b32.xlu0 %v3230_v56, %s2409_s25  ;;  %1470 = vrot.lane.b32.xlu1 %v2266_v7, %s2408_s24  ;;  %v2251_v56 = vld [vmem:[%s2444_s17 + $0x138] sm:$0xff] }
 0x27b   : > { %1486 = vrot.lane.b32.xlu2 %v2274_v53, %s2408_s24 }
 0x27c   : > { %v1511_v36 = vpop.permute.xlu0 %1510  ;;  %v1782_v58 = vld [vmem:[#allocation2] sm:$0xff]  ;;  %v1688_v9 = vpop.permute.xlu1 %1687 }
 0x27d   : > { %1582 = vst.msk [vmem:[#allocation2 + $0xc8] sm:$0xff] %vm1556_vm8, %v1511_v36  ;;  %2326 = vmatmul.msk.f32.vlgmr.msra.gmra.mxu0 %vm1823_vm10, %v1782_v58  ;;  %v1790_v10 = vld [vmem:[#allocation2 + $0x40] sm:$0xff]  ;;  %v1690_v33 = vpop.permute.xlu2 %1689 }
 0x27e   : > { %1767 = vst.msk [vmem:[#allocation2 + $0x88] sm:$0xff] %vm1749_vm9, %v1688_v9  ;;  %2334 = vmatmul.msk.f32.vlgmr.msra.gmra.mxu1 %vm1823_vm10, %v1790_v10 }
 0x27f   : > { %1775 = vst.msk [vmem:[#allocation2 + $0xc8] sm:$0xff] %vm1749_vm9, %v1704_v44  ;;  %v2300_v44 = vld [vmem:[%s2444_s17 + $0x82] sm:$0xff] }
 0x282   : > { %1311 = vrot.lane.b32.xlu0 %v2251_v56, %s2407_s23  ;;  %1327 = vrot.lane.b32.xlu1 %v2259_v62, %s2407_s23 }
 0x283   : > { %1663 = vrot.lane.b32.xlu2 %v2298_v11, %s2409_s25 }
 0x284   : > { %v1463_v12 = vpop.permute.xlu0 %1462  ;;  %v1479_v49 = vpop.permute.xlu1 %1478 }
 0x285   : > { %1558 = vst.msk [vmem:[#allocation2 + $0x8] sm:$0xff] %vm1556_vm8, %v1463_v12  ;;  %v1799_v39 = vld [vmem:[#allocation2 + $0x88] sm:$0xff]  ;;  %v1481_v0 = vpop.permute.xlu2 %1480 }
 0x286   : > { %1566 = vst.msk [vmem:[#allocation2 + $0x48] sm:$0xff] %vm1556_vm8, %v1479_v49  ;;  %2343 = vmatmul.msk.f32.gmra.mxu2 %vm1823_vm10, %v1799_v39  ;;  %v1807_v13 = vld [vmem:[#allocation2 + $0xc8] sm:$0xff] }
 0x287   : > { %2351 = vmatmul.msk.f32.gmra.mxu3 %vm1823_vm10, %v1807_v13  ;;  %1759 = vst.msk [vmem:[#allocation2 + $0x48] sm:$0xff] %vm1749_vm9, %v1672_v8 }
 0x288   : > { %1567 = vst.msk [vmem:[#allocation2 + $0x50] sm:$0xff] %vm1556_vm8, %v1481_v0 }
 0x28a   : > { %1679 = vrot.lane.b32.xlu0 %v2306_v14, %s2409_s25  ;;  %1504 = vrot.lane.b32.xlu1 %v2283_v15, %s2408_s24 }
 0x28b   : > { %1520 = vrot.lane.b32.xlu2 %v2291_v32, %s2408_s24 }
 0x28c   : > { %v1320_v16 = vpop.permute.xlu0 %1319  ;;  %v1656_v17 = vpop.permute.xlu1 %1655 }
 0x28d   : > { %1390 = vst.msk [vmem:[#allocation2 + $0xd0] sm:$0xff] %vm1363_vm6, %v1320_v16  ;;  %v1658_v20 = vpop.permute.xlu2 %1657 }
 0x28e   : > { %1751 = vst.msk [vmem:[#allocation2 + $0x8] sm:$0xff] %vm1749_vm9, %v1656_v17  ;;  %v1791_v18 = vld [vmem:[#allocation2 + $0x48] sm:$0xff] }
 0x28f   : > { %2335 = vmatmul.msk.f32.gmra.mxu1 %vm1823_vm10, %v1791_v18 }
 0x292   : > { %1697 = vrot.lane.b32.xlu0 %v2315_v19, %s2409_s25  ;;  %1713 = vrot.lane.b32.xlu1 %v2323_v50, %s2409_s25  ;;  %v3579_v50 = vld [vmem:[%s3722_s2] ss:$0 sm:$0xff] }
 0x293   : > { %1472 = vrot.lane.b32.xlu2 %v2267_v21, %s2408_s24 }
 0x294   : > { %v1497_v22 = vpop.permute.xlu0 %1496  ;;  %v1513_v23 = vpop.permute.xlu1 %1512 }
 0x295   : > { %1575 = vst.msk [vmem:[#allocation2 + $0x90] sm:$0xff] %vm1556_vm8, %v1497_v22  ;;  %v1783_v24 = vld [vmem:[#allocation2 + $0x8] sm:$0xff]  ;;  %v1515_v27 = vpop.permute.xlu2 %1514 }
 0x296   : > { %1583 = vst.msk [vmem:[#allocation2 + $0xd0] sm:$0xff] %vm1556_vm8, %v1513_v23  ;;  %2327 = vmatmul.msk.f32.gmra.mxu0 %vm1823_vm10, %v1783_v24 }
 0x297   : > { %1768 = vst.msk [vmem:[#allocation2 + $0x90] sm:$0xff] %vm1749_vm9, %v1690_v33 }
 0x29a   : > { %1488 = vrot.lane.b32.xlu0 %v2275_v25, %s2408_s24  ;;  %1313 = vrot.lane.b32.xlu1 %v2252_v26, %s2407_s23 }
 0x29b   : > { %1329 = vrot.lane.b32.xlu2 %v2260_v38, %s2407_s23 }
 0x29c   : > { %v1706_v29 = vpop.permute.xlu0 %1705  ;;  %v1465_v30 = vpop.permute.xlu1 %1464 }
 0x29d   : > { %1776 = vst.msk [vmem:[#allocation2 + $0xd0] sm:$0xff] %vm1749_vm9, %v1706_v29  ;;  %v1467_v45 = vpop.permute.xlu2 %1466 }
 0x29e   : > { %1559 = vst.msk [vmem:[#allocation2 + $0x10] sm:$0xff] %vm1556_vm8, %v1465_v30  ;;  %v1800_v31 = vld [vmem:[#allocation2 + $0x90] sm:$0xff] }
 0x29f   : > { %2344 = vmatmul.msk.f32.gmra.mxu2 %vm1823_vm10, %v1800_v31  ;;  %1752 = vst.msk [vmem:[#allocation2 + $0x10] sm:$0xff] %vm1749_vm9, %v1658_v20 }
 0x2a0   : > { %1560 = vst.msk [vmem:[#allocation2 + $0x18] sm:$0xff] %vm1556_vm8, %v1467_v45 }
 0x2a2   : > { %1665 = vrot.lane.b32.xlu0 %v2299_v42, %s2409_s25  ;;  %1681 = vrot.lane.b32.xlu1 %v2307_v47, %s2409_s25 }
 0x2a3   : > { %1506 = vrot.lane.b32.xlu2 %v2284_v60, %s2408_s24 }
 0x2a4   : > { %v1306_v61 = vpop.permute.xlu0 %1305  ;;  %v1808_v55 = vld [vmem:[#allocation2 + $0xd0] sm:$0xff]  ;;  %v1322_v3 = vpop.permute.xlu1 %1321 }
 0x2a5   : > { %1383 = vst.msk [vmem:[#allocation2 + $0x98] sm:$0xff] %vm1363_vm6, %v1306_v61  ;;  %2352 = vmatmul.msk.f32.gmra.mxu3 %vm1823_vm10, %v1808_v55  ;;  %v1324_v41 = vpop.permute.xlu2 %1323 }
 0x2a6   : > { %1391 = vst.msk [vmem:[#allocation2 + $0xd8] sm:$0xff] %vm1363_vm6, %v1322_v3  ;;  %v1784_v63 = vld [vmem:[#allocation2 + $0x10] sm:$0xff] }
 0x2a7   : > { %1584 = vst.msk [vmem:[#allocation2 + $0xd8] sm:$0xff] %vm1556_vm8, %v1515_v27  ;;  %2328 = vmatmul.msk.f32.gmra.mxu0 %vm1823_vm10, %v1784_v63 }
 0x2a8   : > { %1392 = vst.msk [vmem:[#allocation2 + $0xe0] sm:$0xff] %vm1363_vm6, %v1324_v41 }
 0x2aa   : > { %1522 = vrot.lane.b32.xlu0 %v2292_v48, %s2408_s24  ;;  %1699 = vrot.lane.b32.xlu1 %v2316_v57, %s2409_s25 }
 0x2ab   : > { %1715 = vrot.lane.b32.xlu2 %v2324_v52, %s2409_s25 }
 0x2ac   : > { %v1674_v59 = vpop.permute.xlu0 %1673  ;;  %v1499_v28 = vpop.permute.xlu1 %1498 }
 0x2ad   : > { %1760 = vst.msk [vmem:[#allocation2 + $0x50] sm:$0xff] %vm1749_vm9, %v1674_v59  ;;  %v1501_v54 = vpop.permute.xlu2 %1500 }
 0x2ae   : > { %1576 = vst.msk [vmem:[#allocation2 + $0x98] sm:$0xff] %vm1556_vm8, %v1499_v28 }
 0x2b2   : > { %1474 = vrot.lane.b32.xlu0 %v2268_v37, %s2408_s24  ;;  %1490 = vrot.lane.b32.xlu1 %v2276_v43, %s2408_s24 }
 0x2b3   : > { %1667 = vrot.lane.b32.xlu2 %v2300_v44, %s2409_s25 }
 0x2b4   : > { %v1692_v34 = vpop.permute.xlu0 %1691  ;;  %v1792_v1 = vld [vmem:[#allocation2 + $0x50] sm:$0xff]  ;;  %v1708_v4 = vpop.permute.xlu1 %1707 }
 0x2b5   : > { %1769 = vst.msk [vmem:[#allocation2 + $0x98] sm:$0xff] %vm1749_vm9, %v1692_v34  ;;  %2336 = vmatmul.msk.f32.gmra.mxu1 %vm1823_vm10, %v1792_v1  ;;  %v1710_v5 = vpop.permute.xlu2 %1709 }
 0x2b6   : > { %1777 = vst.msk [vmem:[#allocation2 + $0xd8] sm:$0xff] %vm1749_vm9, %v1708_v4 }
 0x2ba   : > { %1683 = vrot.lane.b32.xlu0 %v2308_v2, %s2409_s25 }
 0x2bc   : > { %v1483_v35 = vpop.permute.xlu0 %1482  ;;  %v1801_v40 = vld [vmem:[#allocation2 + $0x98] sm:$0xff]  ;;  %v1308_v6 = vpop.permute.xlu1 %1307 }
 0x2bd   : > { %1568 = vst.msk [vmem:[#allocation2 + $0x58] sm:$0xff] %vm1556_vm8, %v1483_v35  ;;  %2345 = vmatmul.msk.f32.gmra.mxu2 %vm1823_vm10, %v1801_v40  ;;  %v1809_v46 = vld [vmem:[#allocation2 + $0xd8] sm:$0xff]  ;;  %v1310_v51 = vpop.permute.xlu2 %1309 }
 0x2be   : > { %1384 = vst.msk [vmem:[#allocation2 + $0xa0] sm:$0xff] %vm1363_vm6, %v1308_v6  ;;  %2353 = vmatmul.msk.f32.gmra.mxu3 %vm1823_vm10, %v1809_v46 }
 0x2bf   : > { %1577 = vst.msk [vmem:[#allocation2 + $0xa0] sm:$0xff] %vm1556_vm8, %v1501_v54 }
 0x2c0   : > { %1385 = vst.msk [vmem:[#allocation2 + $0xa8] sm:$0xff] %vm1363_vm6, %v1310_v51 }
 0x2c4   : > { %v1660_v7 = vpop.permute.xlu0 %1659  ;;  %v1676_v8 = vpop.permute.xlu1 %1675 }
 0x2c5   : > { %1753 = vst.msk [vmem:[#allocation2 + $0x18] sm:$0xff] %vm1749_vm9, %v1660_v7  ;;  %v1678_v53 = vpop.permute.xlu2 %1677 }
 0x2c6   : > { %1761 = vst.msk [vmem:[#allocation2 + $0x58] sm:$0xff] %vm1749_vm9, %v1676_v8 }
 0x2cc   : > { %v1517_v36 = vpop.permute.xlu0 %1516  ;;  %v1785_v58 = vld [vmem:[#allocation2 + $0x18] sm:$0xff]  ;;  %v1694_v9 = vpop.permute.xlu1 %1693 }
 0x2cd   : > { %1585 = vst.msk [vmem:[#allocation2 + $0xe0] sm:$0xff] %vm1556_vm8, %v1517_v36  ;;  %2329 = vmatmul.msk.f32.gmra.mxu0 %vm1823_vm10, %v1785_v58  ;;  %v1793_v10 = vld [vmem:[#allocation2 + $0x58] sm:$0xff]  ;;  %v1696_v56 = vpop.permute.xlu2 %1695 }
 0x2ce   : > { %1770 = vst.msk [vmem:[#allocation2 + $0xa0] sm:$0xff] %vm1749_vm9, %v1694_v9  ;;  %2337 = vmatmul.msk.f32.gmra.mxu1 %vm1823_vm10, %v1793_v10 }
 0x2cf   : > { %1778 = vst.msk [vmem:[#allocation2 + $0xe0] sm:$0xff] %vm1749_vm9, %v1710_v5 }
 0x2d4   : > { %v1469_v62 = vpop.permute.xlu0 %1468  ;;  %v1485_v33 = vpop.permute.xlu1 %1484 }
 0x2d5   : > { %1561 = vst.msk [vmem:[#allocation2 + $0x20] sm:$0xff] %vm1556_vm8, %v1469_v62  ;;  %v1802_v11 = vld [vmem:[#allocation2 + $0xa0] sm:$0xff]  ;;  %v1487_v49 = vpop.permute.xlu2 %1486 }
 0x2d6   : > { %1569 = vst.msk [vmem:[#allocation2 + $0x60] sm:$0xff] %vm1556_vm8, %v1485_v33  ;;  %2346 = vmatmul.msk.f32.gmra.mxu2 %vm1823_vm10, %v1802_v11  ;;  %v1810_v12 = vld [vmem:[#allocation2 + $0xe0] sm:$0xff] }
 0x2d7   : > { %2354 = vmatmul.msk.f32.gmra.mxu3 %vm1823_vm10, %v1810_v12  ;;  %1762 = vst.msk [vmem:[#allocation2 + $0x60] sm:$0xff] %vm1749_vm9, %v1678_v53 }
 0x2d8   : > { %1570 = vst.msk [vmem:[#allocation2 + $0x68] sm:$0xff] %vm1556_vm8, %v1487_v49 }
 0x2dc   : > { %v1326_v39 = vpop.permute.xlu0 %1325  ;;  %v1662_v13 = vpop.permute.xlu1 %1661 }
 0x2dd   : > { %1393 = vst.msk [vmem:[#allocation2 + $0xe8] sm:$0xff] %vm1363_vm6, %v1326_v39  ;;  %v1664_v15 = vpop.permute.xlu2 %1663 }
 0x2de   : > { %1754 = vst.msk [vmem:[#allocation2 + $0x20] sm:$0xff] %vm1749_vm9, %v1662_v13  ;;  %v1794_v14 = vld [vmem:[#allocation2 + $0x60] sm:$0xff] }
 0x2df   : > { %2338 = vmatmul.msk.f32.gmra.mxu1 %vm1823_vm10, %v1794_v14 }
 0x2e4   : > { %v1503_v0 = vpop.permute.xlu0 %1502  ;;  %v1519_v32 = vpop.permute.xlu1 %1518 }
 0x2e5   : > { %1578 = vst.msk [vmem:[#allocation2 + $0xa8] sm:$0xff] %vm1556_vm8, %v1503_v0  ;;  %v1786_v16 = vld [vmem:[#allocation2 + $0x20] sm:$0xff]  ;;  %v1521_v17 = vpop.permute.xlu2 %1520 }
 0x2e6   : > { %1586 = vst.msk [vmem:[#allocation2 + $0xe8] sm:$0xff] %vm1556_vm8, %v1519_v32  ;;  %2330 = vmatmul.msk.f32.gmra.mxu0 %vm1823_vm10, %v1786_v16 }
 0x2e7   : > { %1771 = vst.msk [vmem:[#allocation2 + $0xa8] sm:$0xff] %vm1749_vm9, %v1696_v56 }
 0x2ec   : > { %v1712_v18 = vpop.permute.xlu0 %1711  ;;  %v1471_v19 = vpop.permute.xlu1 %1470 }
 0x2ed   : > { %1779 = vst.msk [vmem:[#allocation2 + $0xe8] sm:$0xff] %vm1749_vm9, %v1712_v18  ;;  %v1473_v21 = vpop.permute.xlu2 %1472 }
 0x2ee   : > { %1562 = vst.msk [vmem:[#allocation2 + $0x28] sm:$0xff] %vm1556_vm8, %v1471_v19  ;;  %v1803_v20 = vld [vmem:[#allocation2 + $0xa8] sm:$0xff] }
 0x2ef   : > { %2347 = vmatmul.msk.f32.gmra.mxu2 %vm1823_vm10, %v1803_v20  ;;  %1755 = vst.msk [vmem:[#allocation2 + $0x28] sm:$0xff] %vm1749_vm9, %v1664_v15 }
 0x2f0   : > { %v1989_v22 = vpop.f32.mrf.mxu2  ;;  %1563 = vst.msk [vmem:[#allocation2 + $0x30] sm:$0xff] %vm1556_vm8, %v1473_v21 }
 0x2f1   : > { %v1990_v23 = vadd.f32 %v3579_v50, %v1989_v22  ;;  %v2013_v24 = vpop.f32.mrf.mxu3 }
 0x2f2   : > { %v2014_v25 = vadd.f32 %v3579_v50, %v2013_v24 }
 0x2f3   : > { %2054 = vst.msk [vmem:[%s3587_s16 + $0x80] sm:$0xff] %vm2037_vm11, %v1990_v23 }
 0x2f4   : > { %v1312_v26 = vpop.permute.xlu0 %1311  ;;  %v1811_v27 = vld [vmem:[#allocation2 + $0xe8] sm:$0xff]  ;;  %2062 = vst.msk [vmem:[%s3587_s16 + $0xc0] sm:$0xff] %vm2037_vm11, %v2014_v25  ;;  %v1328_v38 = vpop.permute.xlu1 %1327 }
 0x2f5   : > { %1386 = vst.msk [vmem:[#allocation2 + $0xb0] sm:$0xff] %vm1363_vm6, %v1312_v26  ;;  %2355 = vmatmul.msk.f32.gmra.mxu3 %vm1823_vm10, %v1811_v27  ;;  %v1330_v30 = vpop.permute.xlu2 %1329 }
 0x2f6   : > { %1394 = vst.msk [vmem:[#allocation2 + $0xf0] sm:$0xff] %vm1363_vm6, %v1328_v38  ;;  %v1787_v29 = vld [vmem:[#allocation2 + $0x28] sm:$0xff] }
 0x2f7   : > { %1587 = vst.msk [vmem:[#allocation2 + $0xf0] sm:$0xff] %vm1556_vm8, %v1521_v17  ;;  %2331 = vmatmul.msk.f32.gmra.mxu0 %vm1823_vm10, %v1787_v29 }
 0x2f8   : > { %1395 = vst.msk [vmem:[#allocation2 + $0xf8] sm:$0xff] %vm1363_vm6, %v1330_v30 }
 0x2fa   : > { %v1941_v31 = vpop.f32.mrf.mxu0 }
 0x2fb   : > { %v1942_v42 = vadd.f32 %v3579_v50, %v1941_v31  ;;  %v1965_v47 = vpop.f32.mrf.mxu1 }
 0x2fc   : > { %v1680_v45 = vpop.permute.xlu0 %1679  ;;  %v1966_v60 = vadd.f32 %v3579_v50, %v1965_v47  ;;  %v1505_v61 = vpop.permute.xlu1 %1504 }
 0x2fd   : > { %2038 = vst.msk [vmem:[%s3587_s16] sm:$0xff] %vm2037_vm11, %v1942_v42  ;;  %v1507_v34 = vpop.permute.xlu2 %1506 }
 0x2fe   : > { %1763 = vst.msk [vmem:[#allocation2 + $0x68] sm:$0xff] %vm1749_vm9, %v1680_v45 }
 0x2ff   : > { %2046 = vst.msk [vmem:[%s3587_s16 + $0x40] sm:$0xff] %vm2037_vm11, %v1966_v60 }
 0x300   : > { %1579 = vst.msk [vmem:[#allocation2 + $0xb0] sm:$0xff] %vm1556_vm8, %v1505_v61 }
 0x304   : > { %v1698_v55 = vpop.permute.xlu0 %1697  ;;  %v1714_v3 = vpop.permute.xlu1 %1713 }
 0x305   : > { %1772 = vst.msk [vmem:[#allocation2 + $0xb0] sm:$0xff] %vm1749_vm9, %v1698_v55  ;;  %v1795_v63 = vld [vmem:[#allocation2 + $0x68] sm:$0xff]  ;;  %v1716_v35 = vpop.permute.xlu2 %1715 }
 0x306   : > { %2339 = vmatmul.msk.f32.gmra.mxu1 %vm1823_vm10, %v1795_v63  ;;  %1780 = vst.msk [vmem:[#allocation2 + $0xf0] sm:$0xff] %vm1749_vm9, %v1714_v3 }
 0x309   : > { %v1992_v48 = vpop.f32.mrf.mxu2 }
 0x30a   : > { %v1993_v57 = vadd.f32 %v3579_v50, %v1992_v48  ;;  %v2016_v41 = vpop.f32.mrf.mxu3 }
 0x30b   : > { %v2017_v52 = vadd.f32 %v3579_v50, %v2016_v41 }
 0x30c   : > { %v1489_v59 = vpop.permute.xlu0 %1488  ;;  %v1804_v28 = vld [vmem:[#allocation2 + $0xb0] sm:$0xff]  ;;  %2055 = vst.msk [vmem:[%s3587_s16 + $0x88] sm:$0xff] %vm2037_vm11, %v1993_v57  ;;  %v1314_v37 = vpop.permute.xlu1 %1313 }
 0x30d   : > { %1571 = vst.msk [vmem:[#allocation2 + $0x70] sm:$0xff] %vm1556_vm8, %v1489_v59  ;;  %2348 = vmatmul.msk.f32.gmra.mxu2 %vm1823_vm10, %v1804_v28  ;;  %v1812_v43 = vld [vmem:[#allocation2 + $0xf0] sm:$0xff]  ;;  %v1968_v54 = vpop.f32.mrf.mxu1  ;;  %v1668_v58 = vpop.permute.xlu2 %1667 }
 0x30e   : > { %2063 = vst.msk [vmem:[%s3587_s16 + $0xc8] sm:$0xff] %vm2037_vm11, %v2017_v52  ;;  %2356 = vmatmul.msk.f32.gmra.mxu3 %vm1823_vm10, %v1812_v43  ;;  %v1969_v44 = vadd.f32 %v3579_v50, %v1968_v54 }
 0x30f   : > { %1387 = vst.msk [vmem:[#allocation2 + $0xb8] sm:$0xff] %vm1363_vm6, %v1314_v37 }
 0x310   : > { %2047 = vst.msk [vmem:[%s3587_s16 + $0x48] sm:$0xff] %vm2037_vm11, %v1969_v44 }
 0x311   : > { %1580 = vst.msk [vmem:[#allocation2 + $0xb8] sm:$0xff] %vm1556_vm8, %v1507_v34 }
 0x313   : > { %v1944_v1 = vpop.f32.mrf.mxu0 }
 0x314   : > { %v1666_v4 = vpop.permute.xlu0 %1665  ;;  %v1945_v2 = vadd.f32 %v3579_v50, %v1944_v1  ;;  %v1682_v5 = vpop.permute.xlu1 %1681 }
 0x315   : > { %1756 = vst.msk [vmem:[#allocation2 + $0x30] sm:$0xff] %vm1749_vm9, %v1666_v4 }
 0x316   : > { %2039 = vst.msk [vmem:[%s3587_s16 + $0x8] sm:$0xff] %vm2037_vm11, %v1945_v2 }
 0x317   : > { %1764 = vst.msk [vmem:[#allocation2 + $0x70] sm:$0xff] %vm1749_vm9, %v1682_v5 }
 0x31c   : > { %v1523_v40 = vpop.permute.xlu0 %1522  ;;  %v1788_v6 = vld [vmem:[#allocation2 + $0x30] sm:$0xff]  ;;  %v1700_v46 = vpop.permute.xlu1 %1699 }
 0x31d   : > { %1588 = vst.msk [vmem:[#allocation2 + $0xf8] sm:$0xff] %vm1556_vm8, %v1523_v40  ;;  %2332 = vmatmul.msk.f32.gmra.mxu0 %vm1823_vm10, %v1788_v6 }
 0x31e   : > { %1773 = vst.msk [vmem:[#allocation2 + $0xb8] sm:$0xff] %vm1749_vm9, %v1700_v46  ;;  %v1796_v51 = vld [vmem:[#allocation2 + $0x70] sm:$0xff] }
 0x31f   : > { %1781 = vst.msk [vmem:[#allocation2 + $0xf8] sm:$0xff] %vm1749_vm9, %v1716_v35  ;;  %2340 = vmatmul.msk.f32.gmra.mxu1 %vm1823_vm10, %v1796_v51 }
 0x322   : > { %v1995_v7 = vpop.f32.mrf.mxu2 }
 0x323   : > { %v1996_v8 = vadd.f32 %v3579_v50, %v1995_v7 }
 0x324   : > { %v1475_v53 = vpop.permute.xlu0 %1474  ;;  %v1491_v36 = vpop.permute.xlu1 %1490 }
 0x325   : > { %1564 = vst.msk [vmem:[#allocation2 + $0x38] sm:$0xff] %vm1556_vm8, %v1475_v53  ;;  %v1805_v9 = vld [vmem:[#allocation2 + $0xb8] sm:$0xff]  ;;  %v1947_v10 = vpop.f32.mrf.mxu0 }
 0x326   : > { %2056 = vst.msk [vmem:[%s3587_s16 + $0x90] sm:$0xff] %vm2037_vm11, %v1996_v8  ;;  %2349 = vmatmul.msk.f32.gmra.mxu2 %vm1823_vm10, %v1805_v9  ;;  %v1813_v56 = vld [vmem:[#allocation2 + $0xf8] sm:$0xff]  ;;  %v1948_v62 = vadd.f32 %v3579_v50, %v1947_v10 }
 0x327   : > { %1572 = vst.msk [vmem:[#allocation2 + $0x78] sm:$0xff] %vm1556_vm8, %v1491_v36  ;;  %2357 = vmatmul.msk.f32.gmra.mxu3 %vm1823_vm10, %v1813_v56 }
 0x328   : > { %v2019_v33 = vpop.f32.mrf.mxu3  ;;  %1757 = vst.msk [vmem:[#allocation2 + $0x38] sm:$0xff] %vm1749_vm9, %v1668_v58 }
 0x329   : > { %v2020_v11 = vadd.f32 %v3579_v50, %v2019_v33  ;;  %2040 = vst.msk [vmem:[%s3587_s16 + $0x10] sm:$0xff] %vm2037_vm11, %v1948_v62 }
 0x32b   : > { %2064 = vst.msk [vmem:[%s3587_s16 + $0xd0] sm:$0xff] %vm2037_vm11, %v2020_v11 }
 0x32c   : > { %v1684_v12 = vpop.permute.xlu0 %1683 }
 0x32d   : > { %1765 = vst.msk [vmem:[#allocation2 + $0x78] sm:$0xff] %vm1749_vm9, %v1684_v12 }
 0x32f   : > { %v1789_v49 = vld [vmem:[#allocation2 + $0x38] sm:$0xff] }
 0x330   : > { %2333 = vmatmul.msk.f32.gmra.mxu0 %vm1823_vm10, %v1789_v49 }
 0x332   : > { %v1971_v39 = vpop.f32.mrf.mxu1 }
 0x333   : > { %v1972_v13 = vadd.f32 %v3579_v50, %v1971_v39 }
 0x334   : > { %v1797_v14 = vld [vmem:[#allocation2 + $0x78] sm:$0xff] }
 0x335   : > { %2048 = vst.msk [vmem:[%s3587_s16 + $0x50] sm:$0xff] %vm2037_vm11, %v1972_v13  ;;  %2341 = vmatmul.msk.f32.gmra.mxu1 %vm1823_vm10, %v1797_v14 }
 0x340   : > { %v1998_v15 = vpop.f32.mrf.mxu2 }
 0x341   : > { %v1999_v0 = vadd.f32 %v3579_v50, %v1998_v15  ;;  %v2022_v32 = vpop.f32.mrf.mxu3 }
 0x342   : > { %v2023_v16 = vadd.f32 %v3579_v50, %v2022_v32 }
 0x343   : > { %2057 = vst.msk [vmem:[%s3587_s16 + $0x98] sm:$0xff] %vm2037_vm11, %v1999_v0 }
 0x344   : > { %2065 = vst.msk [vmem:[%s3587_s16 + $0xd8] sm:$0xff] %vm2037_vm11, %v2023_v16 }
 0x34a   : > { %v1950_v17 = vpop.f32.mrf.mxu0 }
 0x34b   : > { %v1951_v18 = vadd.f32 %v3579_v50, %v1950_v17  ;;  %v1974_v19 = vpop.f32.mrf.mxu1 }
 0x34c   : > { %v1975_v20 = vadd.f32 %v3579_v50, %v1974_v19 }
 0x34d   : > { %2041 = vst.msk [vmem:[%s3587_s16 + $0x18] sm:$0xff] %vm2037_vm11, %v1951_v18 }
 0x34e   : > { %2049 = vst.msk [vmem:[%s3587_s16 + $0x58] sm:$0xff] %vm2037_vm11, %v1975_v20 }
 0x359   : > { %v2001_v21 = vpop.f32.mrf.mxu2 }
 0x35a   : > { %v2002_v22 = vadd.f32 %v3579_v50, %v2001_v21  ;;  %v2025_v23 = vpop.f32.mrf.mxu3 }
 0x35b   : > { %v2026_v24 = vadd.f32 %v3579_v50, %v2025_v23 }
 0x35c   : > { %2058 = vst.msk [vmem:[%s3587_s16 + $0xa0] sm:$0xff] %vm2037_vm11, %v2002_v22  ;;  %v1977_v25 = vpop.f32.mrf.mxu1 }
 0x35d   : > { %2066 = vst.msk [vmem:[%s3587_s16 + $0xe0] sm:$0xff] %vm2037_vm11, %v2026_v24  ;;  %v1978_v26 = vadd.f32 %v3579_v50, %v1977_v25 }
 0x35f   : > { %2050 = vst.msk [vmem:[%s3587_s16 + $0x60] sm:$0xff] %vm2037_vm11, %v1978_v26 }
 0x363   : > { %v1953_v27 = vpop.f32.mrf.mxu0 }
 0x364   : > { %v1954_v38 = vadd.f32 %v3579_v50, %v1953_v27 }
 0x366   : > { %2042 = vst.msk [vmem:[%s3587_s16 + $0x20] sm:$0xff] %vm2037_vm11, %v1954_v38 }
 0x372   : > { %v2004_v29 = vpop.f32.mrf.mxu2 }
 0x373   : > { %v2005_v30 = vadd.f32 %v3579_v50, %v2004_v29 }
 0x374   : > { %v1956_v31 = vpop.f32.mrf.mxu0 }
 0x375   : > { %2059 = vst.msk [vmem:[%s3587_s16 + $0xa8] sm:$0xff] %vm2037_vm11, %v2005_v30  ;;  %v1957_v42 = vadd.f32 %v3579_v50, %v1956_v31 }
 0x377   : > { %2043 = vst.msk [vmem:[%s3587_s16 + $0x28] sm:$0xff] %vm2037_vm11, %v1957_v42 }
 0x378   : > { %v2028_v47 = vpop.f32.mrf.mxu3 }
 0x379   : > { %v2029_v45 = vadd.f32 %v3579_v50, %v2028_v47 }
 0x37b   : > { %2067 = vst.msk [vmem:[%s3587_s16 + $0xe8] sm:$0xff] %vm2037_vm11, %v2029_v45 }
 0x383   : > { %v1980_v60 = vpop.f32.mrf.mxu1 }
 0x384   : > { %v1981_v61 = vadd.f32 %v3579_v50, %v1980_v60 }
 0x386   : > { %2051 = vst.msk [vmem:[%s3587_s16 + $0x68] sm:$0xff] %vm2037_vm11, %v1981_v61 }
 0x390   : > { %v2007_v55 = vpop.f32.mrf.mxu2 }
 0x391   : > { %v2008_v3 = vadd.f32 %v3579_v50, %v2007_v55  ;;  %v2031_v63 = vpop.f32.mrf.mxu3 }
 0x392   : > { %v2032_v48 = vadd.f32 %v3579_v50, %v2031_v63 }
 0x393   : > { %2060 = vst.msk [vmem:[%s3587_s16 + $0xb0] sm:$0xff] %vm2037_vm11, %v2008_v3 }
 0x394   : > { %2068 = vst.msk [vmem:[%s3587_s16 + $0xf0] sm:$0xff] %vm2037_vm11, %v2032_v48 }
 0x39a   : > { %v1959_v57 = vpop.f32.mrf.mxu0 }
 0x39b   : > { %v1960_v41 = vadd.f32 %v3579_v50, %v1959_v57 }
 0x39c   : > { %v1983_v52 = vpop.f32.mrf.mxu1 }
 0x39d   : > { %2044 = vst.msk [vmem:[%s3587_s16 + $0x30] sm:$0xff] %vm2037_vm11, %v1960_v41  ;;  %v1984_v59 = vadd.f32 %v3579_v50, %v1983_v52 }
 0x39f   : > { %2052 = vst.msk [vmem:[%s3587_s16 + $0x70] sm:$0xff] %vm2037_vm11, %v1984_v59 }
 0x3a9   : > { %v2010_v28 = vpop.f32.mrf.mxu2 }
 0x3aa   : > { %v2011_v37 = vadd.f32 %v3579_v50, %v2010_v28  ;;  %v2034_v43 = vpop.f32.mrf.mxu3 }
 0x3ab   : > { %v2035_v54 = vadd.f32 %v3579_v50, %v2034_v43 }
 0x3ac   : > { %2061 = vst.msk [vmem:[%s3587_s16 + $0xb8] sm:$0xff] %vm2037_vm11, %v2011_v37 }
 0x3ad   : > { %2069 = vst.msk [vmem:[%s3587_s16 + $0xf8] sm:$0xff] %vm2037_vm11, %v2035_v54  ;;  %v1962_v44 = vpop.f32.mrf.mxu0 }
 0x3ae   : > { %v1963_v34 = vadd.f32 %v3579_v50, %v1962_v44 }
 0x3b0   : > { %2045 = vst.msk [vmem:[%s3587_s16 + $0x38] sm:$0xff] %vm2037_vm11, %v1963_v34 }
 0x3b2   : > { %v1986_v1 = vpop.f32.mrf.mxu1 }
 0x3b3   : > { %v1987_v4 = vadd.f32 %v3579_v50, %v1986_v1 }
 0x3b5   : > { %2053 = vst.msk [vmem:[%s3587_s16 + $0x78] sm:$0xff] %vm2037_vm11, %v1987_v4 }
 0x3b6 PF: > { %s13_s12 = sadd.s32 1, %s2400_s12  }
 0x3b7   : > { %p10_p4 = scmp.ge.s32.totalorder %s13_s12, 4  }
 0x3b9   :  { %12 = sbr.rel (!%p10_p4) target bundleno = 1 (0x1), region = 64 }

</bundles_post_ra>
